<compile_context>
chip_gen: v7x
topology: tpu7x:2x2x1
jax: 0.10.0
libtpu: 0.0.40
codegen_flags: <defaults>
</compile_context>

<pallas_src>
import functools

import jax
import jax.numpy as jnp
from jax.experimental import pallas as pl
from jax.experimental.pallas import tpu as pltpu

LANE = 128


# --------------------------------------------------------------------------- #
# Parameter init helpers (deterministic, mirrors torch init semantics)
# --------------------------------------------------------------------------- #
def xavier_uniform(key, fan_in, fan_out):
    limit = float((6.0 / (fan_in + fan_out)) ** 0.5)
    # stored as [in, out] so the kernel does x @ W  (== torch x @ W.T with W [out, in])
    return jax.random.uniform(key, (fan_in, fan_out), jnp.float32, -limit, limit)


def head_layer_sizes(emb_dim, feat_dim, n_layers):
    spread = [min(emb_dim, feat_dim) + abs(feat_dim - emb_dim) * i
              for i in range(n_layers - 1)]
    return [feat_dim] + spread + [emb_dim]


def make_linear(key, fan_in, fan_out):
    w = xavier_uniform(key, fan_in, fan_out)
    b = jnp.zeros((1, fan_out), jnp.float32)        # bias filled with 0.0 (init_emb)
    return w, b


# --------------------------------------------------------------------------- #
# Padding / stacking glue (plain JAX, runs once per call)
# --------------------------------------------------------------------------- #
def rup(n, m=LANE):
    return ((n + m - 1) // m) * m


def pad2(a, rows, cols):
    return jnp.pad(a, ((0, rows - a.shape[0]), (0, cols - a.shape[1])))


def pad_head(head_params):
    """Pad every Linear of an input head to lane-dense (multiple-of-128) shapes."""
    out = []
    for w, b in head_params:
        out.append((pad2(w, rup(w.shape[0]), rup(w.shape[1])),
                    pad2(b, 1, rup(b.shape[1]))))
    return out


def stack_gc_params(convs, bns, d_pad, h_pad, bn_eps=1e-5):
    """Stack per-layer GIN-MLP weights and folded eval-BN scale/shift on a leading L axis."""
    cw1 = jnp.stack([pad2(c[0][0], d_pad, h_pad) for c in convs])      # [L, Dp, Hp]
    cb1 = jnp.stack([pad2(c[0][1], 1, h_pad) for c in convs])          # [L, 1, Hp]
    cw2 = jnp.stack([pad2(c[1][0], h_pad, d_pad) for c in convs])      # [L, Hp, Dp]
    cb2 = jnp.stack([pad2(c[1][1], 1, d_pad) for c in convs])          # [L, 1, Dp]
    scales, shifts = [], []
    for gamma, beta, mean, var in bns:
        scale = gamma * jax.lax.rsqrt(var + bn_eps)                    # eval-mode BN fold
        shift = beta - mean * scale
        scales.append(pad2(scale, 1, d_pad))
        shifts.append(pad2(shift, 1, d_pad))
    return cw1, cb1, cw2, cb2, jnp.stack(scales), jnp.stack(shifts)


# --------------------------------------------------------------------------- #
# The single fused kernel: heads + num_gc_layers GINEConv/BN(+ReLU) + pool + L2-norm
# --------------------------------------------------------------------------- #
def fused_forward_kernel(
        x_raw, ea_raw,                                     # raw (padded) features
        aw1, ab1, aw2, ab2, aw3, ab3,                      # atom head
        bw1, bb1, bw2, bb2, bw3, bb3,                      # bond head
        gsrc, sdst, pool,                                  # bf16 one-hot graph operators
        cw1, cb1, cw2, cb2, bn_scale, bn_shift,            # per-layer (grid-indexed)
        node_out, z_out,                                   # outputs
        x_acc, ea_acc,                                     # VMEM scratch (persist across layers)
        *, num_layers, gine_eps):
    layer = pl.program_id(0)

    @pl.when(layer == 0)
    def _():
        def head(v, w1, b1, w2, b2, w3, b3):
            # torch source applies ReLU after EVERY Linear (its `if i != n_layers`
            # guard is always true), including the last one.
            h = jnp.maximum(jnp.dot(v, w1[...], preferred_element_type=jnp.float32) + b1[...], 0.0)
            h = jnp.maximum(jnp.dot(h, w2[...], preferred_element_type=jnp.float32) + b2[...], 0.0)
            h = jnp.maximum(jnp.dot(h, w3[...], preferred_element_type=jnp.float32) + b3[...], 0.0)
            return h
        # x.to(torch.int).float(): truncation toward zero, fused into the kernel.
        xv = x_raw[...].astype(jnp.int32).astype(jnp.float32)
        ev = ea_raw[...].astype(jnp.int32).astype(jnp.float32)
        x_acc[...] = head(xv, aw1, ab1, aw2, ab2, aw3, ab3)     # [N, Dp]
        ea_acc[...] = head(ev, bw1, bb1, bw2, bb2, bw3, bb3)    # [E, Dp]

    x = x_acc[...]

    # GINEConv message: relu(x_j + edge_attr). edge_weight=None path (all-ones) elided.
    # One-hot operators are exact in bf16; only MXU operands are bf16, accumulation f32.
    # TODO(synk): at realistic E,N replace the dense one-hot gather/scatter with
    # index-based (scalar-prefetch + tiled) scatter-add to avoid O(E*N) work/VMEM.
    x_src = jnp.dot(gsrc[...], x.astype(jnp.bfloat16),
                    preferred_element_type=jnp.float32)                      # [E, Dp]
    msg = jnp.maximum(x_src + ea_acc[...], 0.0)                              # [E, Dp]
    agg = jnp.dot(sdst[...], msg.astype(jnp.bfloat16),
                  preferred_element_type=jnp.float32)                        # [N, Dp]
    h = x + agg if gine_eps == 0.0 else (1.0 + gine_eps) * x + agg

    # GIN MLP: Linear(D, 2D) -> ReLU -> Linear(2D, D)
    h = jnp.maximum(jnp.dot(h, cw1[...], preferred_element_type=jnp.float32) + cb1[...], 0.0)
    h = jnp.dot(h, cw2[...], preferred_element_type=jnp.float32) + cb2[...]

    # eval-mode BatchNorm folded to scale/shift in glue
    h = h * bn_scale[...] + bn_shift[...]

    # ReLU on all but the last layer; dropout is identity (training=False).
    is_last = layer == num_layers - 1
    x_acc[...] = jnp.maximum(h, 0.0)

    @pl.when(is_last)
    def _():
        x_acc[...] = h                      # last layer: no ReLU

    node_out[...] = x_acc[...]

    @pl.when(is_last)
    def _():
        xl = x_acc[...]
        z = jnp.dot(pool[...], xl.astype(jnp.bfloat16),
                    preferred_element_type=jnp.float32)                      # [G, Dp]
        ssq = jnp.sum(z * z, axis=-1, keepdims=True)
        # torch F.normalize(eps=1e-12) on the norm  ==  rsqrt(max(sumsq, 1e-24))
        z_out[...] = z * jax.lax.rsqrt(jnp.maximum(ssq, 1e-24))


# --------------------------------------------------------------------------- #
# FeaturedEncoder.forward wrapper
# --------------------------------------------------------------------------- #
def featured_encoder_forward(batch, x, edge_index, edge_attr, params, *,
                             num_graphs, num_gc_layers, proj_hidden_dim,
                             edge_weight=None, gine_eps=0.0, bn_eps=1e-5):
    assert edge_weight is None  # TODO(synk): general (non-None) edge_weight path not wired.

    N, F_node = x.shape
    E = edge_index.shape[1]
    F_edge = edge_attr.shape[1]
    G = num_graphs
    D = proj_hidden_dim
    d_pad, h_pad = rup(D), rup(2 * D)
    L = num_gc_layers

    # ---- plain-JAX glue: lane padding, dense graph operators (bf16), BN folding ----
    x_p = pad2(x.astype(jnp.float32), N, rup(F_node))
    ea_p = pad2(edge_attr.astype(jnp.float32), E, rup(F_edge))

    src, dst = edge_index[0], edge_index[1]
    gather_src = jax.nn.one_hot(src, N, dtype=jnp.bfloat16)        # [E, N]  x_j gather
    scatter_dst = jax.nn.one_hot(dst, N, dtype=jnp.bfloat16).T     # [N, E]  scatter-add
    pool_mat = jax.nn.one_hot(batch, G, dtype=jnp.bfloat16).T      # [G, N]  global_add_pool

    atom = pad_head(params["atom_encoder"])
    bond = pad_head(params["bond_encoder"])
    cw1, cb1, cw2, cb2, bn_scale, bn_shift = stack_gc_params(
        params["convs"], params["bns"], d_pad, h_pad, bn_eps)

    # ---- BlockSpecs ----
    def const_spec(shape):
        shape = tuple(int(s) for s in shape)
        return pl.BlockSpec(shape, lambda l, _n=len(shape): (0,) * _n)

    def per_layer_spec(shape):
        shape = tuple(int(s) for s in shape)
        return pl.BlockSpec((None,) + shape, lambda l, _n=len(shape): (l,) + (0,) * _n)

    in_specs = (
        [const_spec(x_p.shape), const_spec(ea_p.shape)]
        + [const_spec(a.shape) for pair in atom for a in pair]
        + [const_spec(a.shape) for pair in bond for a in pair]
        + [const_spec(gather_src.shape), const_spec(scatter_dst.shape),
           const_spec(pool_mat.shape)]
        + [per_layer_spec(cw1.shape[1:]), per_layer_spec(cb1.shape[1:]),
           per_layer_spec(cw2.shape[1:]), per_layer_spec(cb2.shape[1:]),
           per_layer_spec(bn_scale.shape[1:]), per_layer_spec(bn_shift.shape[1:])]
    )
    out_specs = [const_spec((N, d_pad)), const_spec((G, d_pad))]

    kernel = functools.partial(fused_forward_kernel, num_layers=L, gine_eps=gine_eps)

    node_emb_p, z_p = pl.pallas_call(
        kernel,
        out_shape=(jax.ShapeDtypeStruct((N, d_pad), jnp.float32),
                   jax.ShapeDtypeStruct((G, d_pad), jnp.float32)),
        grid_spec=pltpu.PrefetchScalarGridSpec(
            num_scalar_prefetch=0,
            grid=(L,),
            in_specs=in_specs,
            out_specs=out_specs,
            scratch_shapes=[pltpu.VMEM((N, d_pad), jnp.float32),   # x accumulator
                            pltpu.VMEM((E, d_pad), jnp.float32)],  # encoded edge_attr
        ),
        compiler_params=pltpu.CompilerParams(
            dimension_semantics=("arbitrary",),        # layer axis is sequential
            vmem_limit_bytes=64 * 1024 * 1024),
    )(x_p, ea_p,
      *[a for pair in atom for a in pair],
      *[a for pair in bond for a in pair],
      gather_src, scatter_dst, pool_mat,
      cw1, cb1, cw2, cb2, bn_scale, bn_shift)

    # slice back from the lane-padded width to the logical embedding dim
    return z_p[:, :D], node_emb_p[:, :D]


# --------------------------------------------------------------------------- #
# Main: deterministic small-shape run
# --------------------------------------------------------------------------- #
if __name__ == "__main__":
    key = jax.random.PRNGKey(0)

    N, E, G = 16, 32, 2                 # nodes, edges, graphs
    node_feature_dim = 16
    edge_feature_dim = 16
    proj_hidden_dim = 32                # == GIN embedding dim
    input_head_layers = 3
    num_gc_layers = 2

    keys = iter(jax.random.split(key, 64))

    # GenericNodeEncoder / GenericEdgeEncoder parameters (Linear stacks)
    def build_head(feat_dim):
        sizes = head_layer_sizes(proj_hidden_dim, feat_dim, input_head_layers)
        return [make_linear(next(keys), sizes[i], sizes[i + 1])
                for i in range(input_head_layers)]

    params = {
        "atom_encoder": build_head(node_feature_dim),
        "bond_encoder": build_head(edge_feature_dim),
        "convs": [],
        "bns": [],
    }
    D = proj_hidden_dim
    for _ in range(num_gc_layers):
        params["convs"].append([make_linear(next(keys), D, 2 * D),
                                make_linear(next(keys), 2 * D, D)])
        # BatchNorm1d default init: gamma=1, beta=0, running_mean=0, running_var=1
        params["bns"].append((jnp.ones((1, D), jnp.float32),
                              jnp.zeros((1, D), jnp.float32),
                              jnp.zeros((1, D), jnp.float32),
                              jnp.ones((1, D), jnp.float32)))

    # Inputs
    x_in = jax.random.uniform(next(keys), (N, node_feature_dim), jnp.float32, 0.0, 5.0)
    edge_attr_in = jax.random.uniform(next(keys), (E, edge_feature_dim), jnp.float32, 0.0, 5.0)
    edge_index = jax.random.randint(next(keys), (2, E), 0, N, dtype=jnp.int32)
    batch = jnp.concatenate([jnp.zeros((N // 2,), jnp.int32),
                             jnp.ones((N - N // 2,), jnp.int32)])  # node -> graph id

    z, node_emb = featured_encoder_forward(
        batch, x_in, edge_index, edge_attr_in, params,
        num_graphs=G, num_gc_layers=num_gc_layers, proj_hidden_dim=proj_hidden_dim)

    jax.block_until_ready(z)
    jax.block_until_ready(node_emb)
    assert z.shape == (G, proj_hidden_dim)
    assert node_emb.shape == (N, proj_hidden_dim)
    print("KERNEL_OK")
</pallas_src>

<mosaic_0001>
module attributes {stable_mosaic.version = 11 : i64} {
  func.func @fused_forward_kernel(%arg0: i32, %arg1: memref<16x128xf32, #tpu.memory_space<vmem>>, %arg2: memref<32x128xf32, #tpu.memory_space<vmem>>, %arg3: memref<128x128xf32, #tpu.memory_space<vmem>>, %arg4: memref<1x128xf32, #tpu.memory_space<vmem>>, %arg5: memref<128x128xf32, #tpu.memory_space<vmem>>, %arg6: memref<1x128xf32, #tpu.memory_space<vmem>>, %arg7: memref<128x128xf32, #tpu.memory_space<vmem>>, %arg8: memref<1x128xf32, #tpu.memory_space<vmem>>, %arg9: memref<128x128xf32, #tpu.memory_space<vmem>>, %arg10: memref<1x128xf32, #tpu.memory_space<vmem>>, %arg11: memref<128x128xf32, #tpu.memory_space<vmem>>, %arg12: memref<1x128xf32, #tpu.memory_space<vmem>>, %arg13: memref<128x128xf32, #tpu.memory_space<vmem>>, %arg14: memref<1x128xf32, #tpu.memory_space<vmem>>, %arg15: memref<32x16xbf16, #tpu.memory_space<vmem>>, %arg16: memref<16x32xbf16, #tpu.memory_space<vmem>>, %arg17: memref<2x16xbf16, #tpu.memory_space<vmem>>, %arg18: memref<1x128x128xf32, #tpu.memory_space<vmem>>, %arg19: memref<1x1x128xf32, #tpu.memory_space<vmem>>, %arg20: memref<1x128x128xf32, #tpu.memory_space<vmem>>, %arg21: memref<1x1x128xf32, #tpu.memory_space<vmem>>, %arg22: memref<1x1x128xf32, #tpu.memory_space<vmem>>, %arg23: memref<1x1x128xf32, #tpu.memory_space<vmem>>, %arg24: memref<16x128xf32, #tpu.memory_space<vmem>>, %arg25: memref<2x128xf32, #tpu.memory_space<vmem>>, %arg26: memref<16x128xf32, #tpu.memory_space<vmem>>, %arg27: memref<32x128xf32, #tpu.memory_space<vmem>>) attributes {dimension_semantics = [#tpu.dimension_semantics<arbitrary>], iteration_bounds = array<i64: 2>, scalar_prefetch = 0 : i64, scratch_operands = 2 : i64, tpu.core_type = #tpu.core_type<tc>, window_params = [{pipeline_mode = #tpu.pipeline_mode<synchronous>, transform_indices = @transform_0, window_bounds = array<i64: 16, 128>}, {pipeline_mode = #tpu.pipeline_mode<synchronous>, transform_indices = @transform_1, window_bounds = array<i64: 32, 128>}, {pipeline_mode = #tpu.pipeline_mode<synchronous>, transform_indices = @transform_2, window_bounds = array<i64: 128, 128>}, {pipeline_mode = #tpu.pipeline_mode<synchronous>, transform_indices = @transform_3, window_bounds = array<i64: 1, 128>}, {pipeline_mode = #tpu.pipeline_mode<synchronous>, transform_indices = @transform_4, window_bounds = array<i64: 128, 128>}, {pipeline_mode = #tpu.pipeline_mode<synchronous>, transform_indices = @transform_5, window_bounds = array<i64: 1, 128>}, {pipeline_mode = #tpu.pipeline_mode<synchronous>, transform_indices = @transform_6, window_bounds = array<i64: 128, 128>}, {pipeline_mode = #tpu.pipeline_mode<synchronous>, transform_indices = @transform_7, window_bounds = array<i64: 1, 128>}, {pipeline_mode = #tpu.pipeline_mode<synchronous>, transform_indices = @transform_8, window_bounds = array<i64: 128, 128>}, {pipeline_mode = #tpu.pipeline_mode<synchronous>, transform_indices = @transform_9, window_bounds = array<i64: 1, 128>}, {pipeline_mode = #tpu.pipeline_mode<synchronous>, transform_indices = @transform_10, window_bounds = array<i64: 128, 128>}, {pipeline_mode = #tpu.pipeline_mode<synchronous>, transform_indices = @transform_11, window_bounds = array<i64: 1, 128>}, {pipeline_mode = #tpu.pipeline_mode<synchronous>, transform_indices = @transform_12, window_bounds = array<i64: 128, 128>}, {pipeline_mode = #tpu.pipeline_mode<synchronous>, transform_indices = @transform_13, window_bounds = array<i64: 1, 128>}, {pipeline_mode = #tpu.pipeline_mode<synchronous>, transform_indices = @transform_14, window_bounds = array<i64: 32, 16>}, {pipeline_mode = #tpu.pipeline_mode<synchronous>, transform_indices = @transform_15, window_bounds = array<i64: 16, 32>}, {pipeline_mode = #tpu.pipeline_mode<synchronous>, transform_indices = @transform_16, window_bounds = array<i64: 2, 16>}, {transform_indices = @transform_17, window_bounds = array<i64: 1, 128, 128>}, {transform_indices = @transform_18, window_bounds = array<i64: 1, 1, 128>}, {transform_indices = @transform_19, window_bounds = array<i64: 1, 128, 128>}, {transform_indices = @transform_20, window_bounds = array<i64: 1, 1, 128>}, {transform_indices = @transform_21, window_bounds = array<i64: 1, 1, 128>}, {transform_indices = @transform_22, window_bounds = array<i64: 1, 1, 128>}, {pipeline_mode = #tpu.pipeline_mode<synchronous>, transform_indices = @transform_23, window_bounds = array<i64: 16, 128>}, {pipeline_mode = #tpu.pipeline_mode<synchronous>, transform_indices = @transform_24, window_bounds = array<i64: 2, 128>}]} {
    %c0_i32 = arith.constant 0 : i32
    %0 = arith.cmpi eq, %arg0, %c0_i32 : i32
    %1 = arith.extui %0 : i1 to i32
    %c0_i32_0 = arith.constant 0 : i32
    %2 = arith.cmpi ne, %1, %c0_i32_0 : i32
    scf.if %2 {
      %c0_40 = arith.constant 0 : index
      %c0_41 = arith.constant 0 : index
      %49 = vector.load %arg1[%c0_40, %c0_41] : memref<16x128xf32, #tpu.memory_space<vmem>>, vector<16x128xf32>
      %50 = arith.fptosi %49 : vector<16x128xf32> to vector<16x128xi32>
      %51 = arith.sitofp %50 : vector<16x128xi32> to vector<16x128xf32>
      %c0_42 = arith.constant 0 : index
      %c0_43 = arith.constant 0 : index
      %52 = vector.load %arg2[%c0_42, %c0_43] : memref<32x128xf32, #tpu.memory_space<vmem>>, vector<32x128xf32>
      %53 = arith.fptosi %52 : vector<32x128xf32> to vector<32x128xi32>
      %54 = arith.sitofp %53 : vector<32x128xi32> to vector<32x128xf32>
      %c0_44 = arith.constant 0 : index
      %c0_45 = arith.constant 0 : index
      %55 = vector.load %arg3[%c0_44, %c0_45] : memref<128x128xf32, #tpu.memory_space<vmem>>, vector<128x128xf32>
      %cst_46 = arith.constant dense<0.000000e+00> : vector<16x128xf32>
      %56 = tpu.matmul %51, %55, %cst_46 {dimension_numbers = #tpu.dot_dimension_numbers<[1], [0], [0], [1], [0, 0, 1, 1], [], []>} : vector<16x128xf32>, vector<128x128xf32>, vector<16x128xf32> -> vector<16x128xf32>
      %c0_47 = arith.constant 0 : index
      %c0_48 = arith.constant 0 : index
      %57 = vector.load %arg4[%c0_47, %c0_48] : memref<1x128xf32, #tpu.memory_space<vmem>>, vector<1x128xf32>
      %58 = vector.broadcast %57 : vector<1x128xf32> to vector<16x128xf32>
      %59 = arith.addf %56, %58 : vector<16x128xf32>
      %cst_49 = arith.constant 0.000000e+00 : f32
      %60 = vector.broadcast %cst_49 : f32 to vector<16x128xf32>
      %61 = arith.maximumf %59, %60 : vector<16x128xf32>
      %c0_50 = arith.constant 0 : index
      %c0_51 = arith.constant 0 : index
      %62 = vector.load %arg5[%c0_50, %c0_51] : memref<128x128xf32, #tpu.memory_space<vmem>>, vector<128x128xf32>
      %cst_52 = arith.constant dense<0.000000e+00> : vector<16x128xf32>
      %63 = tpu.matmul %61, %62, %cst_52 {dimension_numbers = #tpu.dot_dimension_numbers<[1], [0], [0], [1], [0, 0, 1, 1], [], []>} : vector<16x128xf32>, vector<128x128xf32>, vector<16x128xf32> -> vector<16x128xf32>
      %c0_53 = arith.constant 0 : index
      %c0_54 = arith.constant 0 : index
      %64 = vector.load %arg6[%c0_53, %c0_54] : memref<1x128xf32, #tpu.memory_space<vmem>>, vector<1x128xf32>
      %65 = vector.broadcast %64 : vector<1x128xf32> to vector<16x128xf32>
      %66 = arith.addf %63, %65 : vector<16x128xf32>
      %cst_55 = arith.constant 0.000000e+00 : f32
      %67 = vector.broadcast %cst_55 : f32 to vector<16x128xf32>
      %68 = arith.maximumf %66, %67 : vector<16x128xf32>
      %c0_56 = arith.constant 0 : index
      %c0_57 = arith.constant 0 : index
      %69 = vector.load %arg7[%c0_56, %c0_57] : memref<128x128xf32, #tpu.memory_space<vmem>>, vector<128x128xf32>
      %cst_58 = arith.constant dense<0.000000e+00> : vector<16x128xf32>
      %70 = tpu.matmul %68, %69, %cst_58 {dimension_numbers = #tpu.dot_dimension_numbers<[1], [0], [0], [1], [0, 0, 1, 1], [], []>} : vector<16x128xf32>, vector<128x128xf32>, vector<16x128xf32> -> vector<16x128xf32>
      %c0_59 = arith.constant 0 : index
      %c0_60 = arith.constant 0 : index
      %71 = vector.load %arg8[%c0_59, %c0_60] : memref<1x128xf32, #tpu.memory_space<vmem>>, vector<1x128xf32>
      %72 = vector.broadcast %71 : vector<1x128xf32> to vector<16x128xf32>
      %73 = arith.addf %70, %72 : vector<16x128xf32>
      %cst_61 = arith.constant 0.000000e+00 : f32
      %74 = vector.broadcast %cst_61 : f32 to vector<16x128xf32>
      %75 = arith.maximumf %73, %74 : vector<16x128xf32>
      %c0_62 = arith.constant 0 : index
      %c0_63 = arith.constant 0 : index
      %76 = vector.load %arg26[%c0_62, %c0_63] : memref<16x128xf32, #tpu.memory_space<vmem>>, vector<16x128xf32>
      tpu.vector_store %arg26[%c0_62, %c0_63], %75 {strides = array<i32>} : memref<16x128xf32, #tpu.memory_space<vmem>>, vector<16x128xf32>,
      %c0_64 = arith.constant 0 : index
      %c0_65 = arith.constant 0 : index
      %77 = vector.load %arg9[%c0_64, %c0_65] : memref<128x128xf32, #tpu.memory_space<vmem>>, vector<128x128xf32>
      %cst_66 = arith.constant dense<0.000000e+00> : vector<32x128xf32>
      %78 = tpu.matmul %54, %77, %cst_66 {dimension_numbers = #tpu.dot_dimension_numbers<[1], [0], [0], [1], [0, 0, 1, 1], [], []>} : vector<32x128xf32>, vector<128x128xf32>, vector<32x128xf32> -> vector<32x128xf32>
      %c0_67 = arith.constant 0 : index
      %c0_68 = arith.constant 0 : index
      %79 = vector.load %arg10[%c0_67, %c0_68] : memref<1x128xf32, #tpu.memory_space<vmem>>, vector<1x128xf32>
      %80 = vector.broadcast %79 : vector<1x128xf32> to vector<32x128xf32>
      %81 = arith.addf %78, %80 : vector<32x128xf32>
      %cst_69 = arith.constant 0.000000e+00 : f32
      %82 = vector.broadcast %cst_69 : f32 to vector<32x128xf32>
      %83 = arith.maximumf %81, %82 : vector<32x128xf32>
      %c0_70 = arith.constant 0 : index
      %c0_71 = arith.constant 0 : index
      %84 = vector.load %arg11[%c0_70, %c0_71] : memref<128x128xf32, #tpu.memory_space<vmem>>, vector<128x128xf32>
      %cst_72 = arith.constant dense<0.000000e+00> : vector<32x128xf32>
      %85 = tpu.matmul %83, %84, %cst_72 {dimension_numbers = #tpu.dot_dimension_numbers<[1], [0], [0], [1], [0, 0, 1, 1], [], []>} : vector<32x128xf32>, vector<128x128xf32>, vector<32x128xf32> -> vector<32x128xf32>
      %c0_73 = arith.constant 0 : index
      %c0_74 = arith.constant 0 : index
      %86 = vector.load %arg12[%c0_73, %c0_74] : memref<1x128xf32, #tpu.memory_space<vmem>>, vector<1x128xf32>
      %87 = vector.broadcast %86 : vector<1x128xf32> to vector<32x128xf32>
      %88 = arith.addf %85, %87 : vector<32x128xf32>
      %cst_75 = arith.constant 0.000000e+00 : f32
      %89 = vector.broadcast %cst_75 : f32 to vector<32x128xf32>
      %90 = arith.maximumf %88, %89 : vector<32x128xf32>
      %c0_76 = arith.constant 0 : index
      %c0_77 = arith.constant 0 : index
      %91 = vector.load %arg13[%c0_76, %c0_77] : memref<128x128xf32, #tpu.memory_space<vmem>>, vector<128x128xf32>
      %cst_78 = arith.constant dense<0.000000e+00> : vector<32x128xf32>
      %92 = tpu.matmul %90, %91, %cst_78 {dimension_numbers = #tpu.dot_dimension_numbers<[1], [0], [0], [1], [0, 0, 1, 1], [], []>} : vector<32x128xf32>, vector<128x128xf32>, vector<32x128xf32> -> vector<32x128xf32>
      %c0_79 = arith.constant 0 : index
      %c0_80 = arith.constant 0 : index
      %93 = vector.load %arg14[%c0_79, %c0_80] : memref<1x128xf32, #tpu.memory_space<vmem>>, vector<1x128xf32>
      %94 = vector.broadcast %93 : vector<1x128xf32> to vector<32x128xf32>
      %95 = arith.addf %92, %94 : vector<32x128xf32>
      %cst_81 = arith.constant 0.000000e+00 : f32
      %96 = vector.broadcast %cst_81 : f32 to vector<32x128xf32>
      %97 = arith.maximumf %95, %96 : vector<32x128xf32>
      %c0_82 = arith.constant 0 : index
      %c0_83 = arith.constant 0 : index
      %98 = vector.load %arg27[%c0_82, %c0_83] : memref<32x128xf32, #tpu.memory_space<vmem>>, vector<32x128xf32>
      tpu.vector_store %arg27[%c0_82, %c0_83], %97 {strides = array<i32>} : memref<32x128xf32, #tpu.memory_space<vmem>>, vector<32x128xf32>,
    } else {
    }
    %c0 = arith.constant 0 : index
    %c0_1 = arith.constant 0 : index
    %3 = vector.load %arg26[%c0, %c0_1] : memref<16x128xf32, #tpu.memory_space<vmem>>, vector<16x128xf32>
    %c0_2 = arith.constant 0 : index
    %c0_3 = arith.constant 0 : index
    %4 = vector.load %arg15[%c0_2, %c0_3] : memref<32x16xbf16, #tpu.memory_space<vmem>>, vector<32x16xbf16>
    %5 = arith.truncf %3 : vector<16x128xf32> to vector<16x128xbf16>
    %cst = arith.constant dense<0.000000e+00> : vector<32x128xf32>
    %6 = tpu.matmul %4, %5, %cst {dimension_numbers = #tpu.dot_dimension_numbers<[1], [0], [0], [1], [0, 0, 1, 1], [], []>} : vector<32x16xbf16>, vector<16x128xbf16>, vector<32x128xf32> -> vector<32x128xf32>
    %c0_4 = arith.constant 0 : index
    %c0_5 = arith.constant 0 : index
    %7 = vector.load %arg27[%c0_4, %c0_5] : memref<32x128xf32, #tpu.memory_space<vmem>>, vector<32x128xf32>
    %8 = arith.addf %6, %7 : vector<32x128xf32>
    %cst_6 = arith.constant 0.000000e+00 : f32
    %9 = vector.broadcast %cst_6 : f32 to vector<32x128xf32>
    %10 = arith.maximumf %8, %9 : vector<32x128xf32>
    %c0_7 = arith.constant 0 : index
    %c0_8 = arith.constant 0 : index
    %11 = vector.load %arg16[%c0_7, %c0_8] : memref<16x32xbf16, #tpu.memory_space<vmem>>, vector<16x32xbf16>
    %12 = arith.truncf %10 : vector<32x128xf32> to vector<32x128xbf16>
    %cst_9 = arith.constant dense<0.000000e+00> : vector<16x128xf32>
    %13 = tpu.matmul %11, %12, %cst_9 {dimension_numbers = #tpu.dot_dimension_numbers<[1], [0], [0], [1], [0, 0, 1, 1], [], []>} : vector<16x32xbf16>, vector<32x128xbf16>, vector<16x128xf32> -> vector<16x128xf32>
    %14 = arith.addf %3, %13 : vector<16x128xf32>
    %c0_10 = arith.constant 0 : index
    %c0_11 = arith.constant 0 : index
    %c0_12 = arith.constant 0 : index
    %15 = vector.load %arg18[%c0_10, %c0_11, %c0_12] : memref<1x128x128xf32, #tpu.memory_space<vmem>>, vector<1x128x128xf32>
    %16 = vector.shape_cast %15 : vector<1x128x128xf32> to vector<128x128xf32>
    %cst_13 = arith.constant dense<0.000000e+00> : vector<16x128xf32>
    %17 = tpu.matmul %14, %16, %cst_13 {dimension_numbers = #tpu.dot_dimension_numbers<[1], [0], [0], [1], [0, 0, 1, 1], [], []>} : vector<16x128xf32>, vector<128x128xf32>, vector<16x128xf32> -> vector<16x128xf32>
    %c0_14 = arith.constant 0 : index
    %c0_15 = arith.constant 0 : index
    %c0_16 = arith.constant 0 : index
    %18 = vector.load %arg19[%c0_14, %c0_15, %c0_16] : memref<1x1x128xf32, #tpu.memory_space<vmem>>, vector<1x1x128xf32>
    %19 = vector.shape_cast %18 : vector<1x1x128xf32> to vector<1x128xf32>
    %20 = vector.broadcast %19 : vector<1x128xf32> to vector<16x128xf32>
    %21 = arith.addf %17, %20 : vector<16x128xf32>
    %cst_17 = arith.constant 0.000000e+00 : f32
    %22 = vector.broadcast %cst_17 : f32 to vector<16x128xf32>
    %23 = arith.maximumf %21, %22 : vector<16x128xf32>
    %c0_18 = arith.constant 0 : index
    %c0_19 = arith.constant 0 : index
    %c0_20 = arith.constant 0 : index
    %24 = vector.load %arg20[%c0_18, %c0_19, %c0_20] : memref<1x128x128xf32, #tpu.memory_space<vmem>>, vector<1x128x128xf32>
    %25 = vector.shape_cast %24 : vector<1x128x128xf32> to vector<128x128xf32>
    %cst_21 = arith.constant dense<0.000000e+00> : vector<16x128xf32>
    %26 = tpu.matmul %23, %25, %cst_21 {dimension_numbers = #tpu.dot_dimension_numbers<[1], [0], [0], [1], [0, 0, 1, 1], [], []>} : vector<16x128xf32>, vector<128x128xf32>, vector<16x128xf32> -> vector<16x128xf32>
    %c0_22 = arith.constant 0 : index
    %c0_23 = arith.constant 0 : index
    %c0_24 = arith.constant 0 : index
    %27 = vector.load %arg21[%c0_22, %c0_23, %c0_24] : memref<1x1x128xf32, #tpu.memory_space<vmem>>, vector<1x1x128xf32>
    %28 = vector.shape_cast %27 : vector<1x1x128xf32> to vector<1x128xf32>
    %29 = vector.broadcast %28 : vector<1x128xf32> to vector<16x128xf32>
    %30 = arith.addf %26, %29 : vector<16x128xf32>
    %c0_25 = arith.constant 0 : index
    %c0_26 = arith.constant 0 : index
    %c0_27 = arith.constant 0 : index
    %31 = vector.load %arg22[%c0_25, %c0_26, %c0_27] : memref<1x1x128xf32, #tpu.memory_space<vmem>>, vector<1x1x128xf32>
    %32 = vector.shape_cast %31 : vector<1x1x128xf32> to vector<1x128xf32>
    %33 = vector.broadcast %32 : vector<1x128xf32> to vector<16x128xf32>
    %34 = arith.mulf %30, %33 : vector<16x128xf32>
    %c0_28 = arith.constant 0 : index
    %c0_29 = arith.constant 0 : index
    %c0_30 = arith.constant 0 : index
    %35 = vector.load %arg23[%c0_28, %c0_29, %c0_30] : memref<1x1x128xf32, #tpu.memory_space<vmem>>, vector<1x1x128xf32>
    %36 = vector.shape_cast %35 : vector<1x1x128xf32> to vector<1x128xf32>
    %37 = vector.broadcast %36 : vector<1x128xf32> to vector<16x128xf32>
    %38 = arith.addf %34, %37 : vector<16x128xf32>
    %c1_i32 = arith.constant 1 : i32
    %39 = arith.cmpi eq, %arg0, %c1_i32 : i32
    %cst_31 = arith.constant 0.000000e+00 : f32
    %40 = vector.broadcast %cst_31 : f32 to vector<16x128xf32>
    %41 = arith.maximumf %38, %40 : vector<16x128xf32>
    %c0_32 = arith.constant 0 : index
    %c0_33 = arith.constant 0 : index
    %42 = vector.load %arg26[%c0_32, %c0_33] : memref<16x128xf32, #tpu.memory_space<vmem>>, vector<16x128xf32>
    tpu.vector_store %arg26[%c0_32, %c0_33], %41 {strides = array<i32>} : memref<16x128xf32, #tpu.memory_space<vmem>>, vector<16x128xf32>,
    %43 = arith.extui %39 : i1 to i32
    %c0_i32_34 = arith.constant 0 : i32
    %44 = arith.cmpi ne, %43, %c0_i32_34 : i32
    scf.if %44 {
      %c0_40 = arith.constant 0 : index
      %c0_41 = arith.constant 0 : index
      %49 = vector.load %arg26[%c0_40, %c0_41] : memref<16x128xf32, #tpu.memory_space<vmem>>, vector<16x128xf32>
      tpu.vector_store %arg26[%c0_40, %c0_41], %38 {strides = array<i32>} : memref<16x128xf32, #tpu.memory_space<vmem>>, vector<16x128xf32>,
    } else {
    }
    %c0_35 = arith.constant 0 : index
    %c0_36 = arith.constant 0 : index
    %45 = vector.load %arg26[%c0_35, %c0_36] : memref<16x128xf32, #tpu.memory_space<vmem>>, vector<16x128xf32>
    %c0_37 = arith.constant 0 : index
    %c0_38 = arith.constant 0 : index
    %46 = vector.load %arg24[%c0_37, %c0_38] : memref<16x128xf32, #tpu.memory_space<vmem>>, vector<16x128xf32>
    tpu.vector_store %arg24[%c0_37, %c0_38], %45 {strides = array<i32>} : memref<16x128xf32, #tpu.memory_space<vmem>>, vector<16x128xf32>,
    %47 = arith.extui %39 : i1 to i32
    %c0_i32_39 = arith.constant 0 : i32
    %48 = arith.cmpi ne, %47, %c0_i32_39 : i32
    scf.if %48 {
      %c0_40 = arith.constant 0 : index
      %c0_41 = arith.constant 0 : index
      %49 = vector.load %arg26[%c0_40, %c0_41] : memref<16x128xf32, #tpu.memory_space<vmem>>, vector<16x128xf32>
      %c0_42 = arith.constant 0 : index
      %c0_43 = arith.constant 0 : index
      %50 = vector.load %arg17[%c0_42, %c0_43] : memref<2x16xbf16, #tpu.memory_space<vmem>>, vector<2x16xbf16>
      %51 = arith.truncf %49 : vector<16x128xf32> to vector<16x128xbf16>
      %cst_44 = arith.constant dense<0.000000e+00> : vector<2x128xf32>
      %52 = tpu.matmul %50, %51, %cst_44 {dimension_numbers = #tpu.dot_dimension_numbers<[1], [0], [0], [1], [0, 0, 1, 1], [], []>} : vector<2x16xbf16>, vector<16x128xbf16>, vector<2x128xf32> -> vector<2x128xf32>
      %53 = arith.mulf %52, %52 : vector<2x128xf32>
      %cst_45 = arith.constant dense<0.000000e+00> : vector<2xf32>
      %54 = vector.multi_reduction <add>, %53, %cst_45 [1] : vector<2x128xf32> to vector<2xf32>
      %55 = vector.shape_cast %54 : vector<2xf32> to vector<2x1xf32>
      %cst_46 = arith.constant 1.000000e-24 : f32
      %56 = vector.broadcast %cst_46 : f32 to vector<2x1xf32>
      %57 = arith.maximumf %55, %56 : vector<2x1xf32>
      %58 = math.rsqrt %57 : vector<2x1xf32>
      %59 = vector.broadcast %58 : vector<2x1xf32> to vector<2x128xf32>
      %60 = arith.mulf %52, %59 : vector<2x128xf32>
      %c0_47 = arith.constant 0 : index
      %c0_48 = arith.constant 0 : index
      %61 = vector.load %arg25[%c0_47, %c0_48] : memref<2x128xf32, #tpu.memory_space<vmem>>, vector<2x128xf32>
      tpu.vector_store %arg25[%c0_47, %c0_48], %60 {strides = array<i32>} : memref<2x128xf32, #tpu.memory_space<vmem>>, vector<2x128xf32>,
    } else {
    }
    return
  }
  func.func @transform_0(%arg0: i32) -> (i32, i32) {
    %c0_i32 = arith.constant 0 : i32
    %c0_i32_0 = arith.constant 0 : i32
    %c0_i32_1 = arith.constant 0 : i32
    return %c0_i32, %c0_i32_0 : i32, i32
  }
  func.func @transform_1(%arg0: i32) -> (i32, i32) {
    %c0_i32 = arith.constant 0 : i32
    %c0_i32_0 = arith.constant 0 : i32
    %c0_i32_1 = arith.constant 0 : i32
    return %c0_i32, %c0_i32_0 : i32, i32
  }
  func.func @transform_2(%arg0: i32) -> (i32, i32) {
    %c0_i32 = arith.constant 0 : i32
    %c0_i32_0 = arith.constant 0 : i32
    %c0_i32_1 = arith.constant 0 : i32
    return %c0_i32, %c0_i32_0 : i32, i32
  }
  func.func @transform_3(%arg0: i32) -> (i32, i32) {
    %c0_i32 = arith.constant 0 : i32
    %c0_i32_0 = arith.constant 0 : i32
    %c0_i32_1 = arith.constant 0 : i32
    return %c0_i32, %c0_i32_0 : i32, i32
  }
  func.func @transform_4(%arg0: i32) -> (i32, i32) {
    %c0_i32 = arith.constant 0 : i32
    %c0_i32_0 = arith.constant 0 : i32
    %c0_i32_1 = arith.constant 0 : i32
    return %c0_i32, %c0_i32_0 : i32, i32
  }
  func.func @transform_5(%arg0: i32) -> (i32, i32) {
    %c0_i32 = arith.constant 0 : i32
    %c0_i32_0 = arith.constant 0 : i32
    %c0_i32_1 = arith.constant 0 : i32
    return %c0_i32, %c0_i32_0 : i32, i32
  }
  func.func @transform_6(%arg0: i32) -> (i32, i32) {
    %c0_i32 = arith.constant 0 : i32
    %c0_i32_0 = arith.constant 0 : i32
    %c0_i32_1 = arith.constant 0 : i32
    return %c0_i32, %c0_i32_0 : i32, i32
  }
  func.func @transform_7(%arg0: i32) -> (i32, i32) {
    %c0_i32 = arith.constant 0 : i32
    %c0_i32_0 = arith.constant 0 : i32
    %c0_i32_1 = arith.constant 0 : i32
    return %c0_i32, %c0_i32_0 : i32, i32
  }
  func.func @transform_8(%arg0: i32) -> (i32, i32) {
    %c0_i32 = arith.constant 0 : i32
    %c0_i32_0 = arith.constant 0 : i32
    %c0_i32_1 = arith.constant 0 : i32
    return %c0_i32, %c0_i32_0 : i32, i32
  }
  func.func @transform_9(%arg0: i32) -> (i32, i32) {
    %c0_i32 = arith.constant 0 : i32
    %c0_i32_0 = arith.constant 0 : i32
    %c0_i32_1 = arith.constant 0 : i32
    return %c0_i32, %c0_i32_0 : i32, i32
  }
  func.func @transform_10(%arg0: i32) -> (i32, i32) {
    %c0_i32 = arith.constant 0 : i32
    %c0_i32_0 = arith.constant 0 : i32
    %c0_i32_1 = arith.constant 0 : i32
    return %c0_i32, %c0_i32_0 : i32, i32
  }
  func.func @transform_11(%arg0: i32) -> (i32, i32) {
    %c0_i32 = arith.constant 0 : i32
    %c0_i32_0 = arith.constant 0 : i32
    %c0_i32_1 = arith.constant 0 : i32
    return %c0_i32, %c0_i32_0 : i32, i32
  }
  func.func @transform_12(%arg0: i32) -> (i32, i32) {
    %c0_i32 = arith.constant 0 : i32
    %c0_i32_0 = arith.constant 0 : i32
    %c0_i32_1 = arith.constant 0 : i32
    return %c0_i32, %c0_i32_0 : i32, i32
  }
  func.func @transform_13(%arg0: i32) -> (i32, i32) {
    %c0_i32 = arith.constant 0 : i32
    %c0_i32_0 = arith.constant 0 : i32
    %c0_i32_1 = arith.constant 0 : i32
    return %c0_i32, %c0_i32_0 : i32, i32
  }
  func.func @transform_14(%arg0: i32) -> (i32, i32) {
    %c0_i32 = arith.constant 0 : i32
    %c0_i32_0 = arith.constant 0 : i32
    %c0_i32_1 = arith.constant 0 : i32
    return %c0_i32, %c0_i32_0 : i32, i32
  }
  func.func @transform_15(%arg0: i32) -> (i32, i32) {
    %c0_i32 = arith.constant 0 : i32
    %c0_i32_0 = arith.constant 0 : i32
    %c0_i32_1 = arith.constant 0 : i32
    return %c0_i32, %c0_i32_0 : i32, i32
  }
  func.func @transform_16(%arg0: i32) -> (i32, i32) {
    %c0_i32 = arith.constant 0 : i32
    %c0_i32_0 = arith.constant 0 : i32
    %c0_i32_1 = arith.constant 0 : i32
    return %c0_i32, %c0_i32_0 : i32, i32
  }
  func.func @transform_17(%arg0: i32) -> (i32, i32, i32) {
    %c0_i32 = arith.constant 0 : i32
    %c0_i32_0 = arith.constant 0 : i32
    %c0_i32_1 = arith.constant 0 : i32
    return %arg0, %c0_i32, %c0_i32_0 : i32, i32, i32
  }
  func.func @transform_18(%arg0: i32) -> (i32, i32, i32) {
    %c0_i32 = arith.constant 0 : i32
    %c0_i32_0 = arith.constant 0 : i32
    %c0_i32_1 = arith.constant 0 : i32
    return %arg0, %c0_i32, %c0_i32_0 : i32, i32, i32
  }
  func.func @transform_19(%arg0: i32) -> (i32, i32, i32) {
    %c0_i32 = arith.constant 0 : i32
    %c0_i32_0 = arith.constant 0 : i32
    %c0_i32_1 = arith.constant 0 : i32
    return %arg0, %c0_i32, %c0_i32_0 : i32, i32, i32
  }
  func.func @transform_20(%arg0: i32) -> (i32, i32, i32) {
    %c0_i32 = arith.constant 0 : i32
    %c0_i32_0 = arith.constant 0 : i32
    %c0_i32_1 = arith.constant 0 : i32
    return %arg0, %c0_i32, %c0_i32_0 : i32, i32, i32
  }
  func.func @transform_21(%arg0: i32) -> (i32, i32, i32) {
    %c0_i32 = arith.constant 0 : i32
    %c0_i32_0 = arith.constant 0 : i32
    %c0_i32_1 = arith.constant 0 : i32
    return %arg0, %c0_i32, %c0_i32_0 : i32, i32, i32
  }
  func.func @transform_22(%arg0: i32) -> (i32, i32, i32) {
    %c0_i32 = arith.constant 0 : i32
    %c0_i32_0 = arith.constant 0 : i32
    %c0_i32_1 = arith.constant 0 : i32
    return %arg0, %c0_i32, %c0_i32_0 : i32, i32, i32
  }
  func.func @transform_23(%arg0: i32) -> (i32, i32) {
    %c0_i32 = arith.constant 0 : i32
    %c0_i32_0 = arith.constant 0 : i32
    %c0_i32_1 = arith.constant 0 : i32
    return %c0_i32, %c0_i32_0 : i32, i32
  }
  func.func @transform_24(%arg0: i32) -> (i32, i32) {
    %c0_i32 = arith.constant 0 : i32
    %c0_i32_0 = arith.constant 0 : i32
    %c0_i32_1 = arith.constant 0 : i32
    return %c0_i32, %c0_i32_0 : i32, i32
  }
}

</mosaic_0001>

<bundles_post_ra>
// kernel: tpu_custom_call.1
= control target key start
LH: loop header
LB: loop body
LE: loop exit
PB: predicated region body
PF: predicated region fallthrough
CT: control target
= control target key end

     0   :  { %s5413_s0 = inlined_call_operand.hbm [shape: f32[16,128], index: 0, kind: input, shape index: {}]   ;;  %s5414_s1 = inlined_call_operand.hbm [shape: f32[32,128], index: 1, kind: input, shape index: {}]   ;;  %s5415_s2 = inlined_call_operand.hbm [shape: f32[128,128], index: 2, kind: input, shape index: {}]   ;;  %s5416_s3 = inlined_call_operand.hbm [shape: f32[1,128], index: 3, kind: input, shape index: {}]   ;;  %s5417_s4 = inlined_call_operand.hbm [shape: f32[128,128], index: 4, kind: input, shape index: {}]   ;;  %s5418_s5 = inlined_call_operand.hbm [shape: f32[1,128], index: 5, kind: input, shape index: {}]   ;;  %s5419_s6 = inlined_call_operand.hbm [shape: f32[128,128], index: 6, kind: input, shape index: {}]   ;;  %s5420_s7 = inlined_call_operand.hbm [shape: f32[1,128], index: 7, kind: input, shape index: {}]   ;;  %s5421_s8 = inlined_call_operand.hbm [shape: f32[128,128], index: 8, kind: input, shape index: {}]   ;;  %s5422_s9 = inlined_call_operand.hbm [shape: f32[1,128], index: 9, kind: input, shape index: {}]   ;;  %s5423_s10 = inlined_call_operand.hbm [shape: f32[128,128], index: 10, kind: input, shape index: {}]   ;;  %s5424_s11 = inlined_call_operand.hbm [shape: f32[1,128], index: 11, kind: input, shape index: {}]   ;;  %s5425_s12 = inlined_call_operand.hbm [shape: f32[128,128], index: 12, kind: input, shape index: {}]   ;;  %s5426_s13 = inlined_call_operand.hbm [shape: f32[1,128], index: 13, kind: input, shape index: {}]   ;;  %s5427_s14 = inlined_call_operand.hbm [shape: bf16[32,16], index: 14, kind: input, shape index: {}]   ;;  %s5428_s15 = inlined_call_operand.hbm [shape: bf16[16,32], index: 15, kind: input, shape index: {}]   ;;  %s5429_s16 = inlined_call_operand.hbm [shape: bf16[2,16], index: 16, kind: input, shape index: {}]   ;;  %s5430_s17 = inlined_call_operand.hbm [shape: f32[2,128,128], index: 17, kind: input, shape index: {}]   ;;  %s5431_s18 = inlined_call_operand.hbm [shape: f32[2,1,128], index: 18, kind: input, shape index: {}]   ;;  %s5432_s19 = inlined_call_operand.hbm [shape: f32[2,128,128], index: 19, kind: input, shape index: {}]   ;;  %s5433_s20 = inlined_call_operand.hbm [shape: f32[2,1,128], index: 20, kind: input, shape index: {}]   ;;  %s5434_s21 = inlined_call_operand.hbm [shape: f32[2,1,128], index: 21, kind: input, shape index: {}]   ;;  %s5435_s22 = inlined_call_operand.hbm [shape: f32[2,1,128], index: 22, kind: input, shape index: {}]   ;;  %s5436_s23 = inlined_call_operand.hbm [shape: f32[16,128], index: 23, kind: output, shape index: {0}]   ;;  %s5437_s24 = inlined_call_operand.hbm [shape: f32[2,128], index: 24, kind: output, shape index: {1}]  }
   0x1   :  { %5485 = sst [smem:[#allocation60_spill]] %s5413_s0 }
   0x2   :  { %5486 = sst [smem:[#allocation61_spill]] %s5414_s1 }
   0x3   :  { %5487 = sst [smem:[#allocation62_spill]] %s5415_s2 }
   0x4   :  { %5488 = sst [smem:[#allocation63_spill]] %s5416_s3 }
   0x5   :  { %5489 = sst [smem:[#allocation64_spill]] %s5417_s4 }
   0x6   :  { %5490 = sst [smem:[#allocation65_spill]] %s5418_s5 }
   0x7   :  { %5491 = sst [smem:[#allocation66_spill]] %s5419_s6 }
   0x8   :  { %5492 = sst [smem:[#allocation67_spill]] %s5420_s7 }
   0x9   :  { %5493 = sst [smem:[#allocation68_spill]] %s5421_s8 }
   0xa   :  { %5494 = sst [smem:[#allocation69_spill]] %s5422_s9 }
   0xb   :  { %5495 = sst [smem:[#allocation70_spill]] %s5423_s10 }
   0xc   :  { %5496 = sst [smem:[#allocation71_spill]] %s5424_s11 }
   0xd   :  { %5497 = sst [smem:[#allocation72_spill]] %s5425_s12 }
   0xe   :  { %5498 = sst [smem:[#allocation73_spill]] %s5426_s13 }
   0xf   :  { %5499 = sst [smem:[#allocation74_spill]] %s5427_s14 }
  0x10   :  { %5500 = sst [smem:[#allocation75_spill]] %s5428_s15 }
  0x11   :  { %5501 = sst [smem:[#allocation76_spill]] %s5429_s16 }
  0x12   :  { %5502 = sst [smem:[#allocation77_spill]] %s5430_s17 }
  0x13   :  { %5503 = sst [smem:[#allocation78_spill]] %s5431_s18 }
  0x14   :  { %5504 = sst [smem:[#allocation79_spill]] %s5432_s19 }
  0x15   :  { %5505 = sst [smem:[#allocation80_spill]] %s5433_s20 }
  0x16   :  { %5506 = sst [smem:[#allocation81_spill]] %s5435_s22 }
  0x17   :  { %5507 = sst [smem:[#allocation82_spill]] %s5436_s23 }
  0x18   :  { %5508 = sst [smem:[#allocation83_spill]] %s5437_s24 }
  0x19   :  { %30 = vsyncpa [#allocation5], 0 }
  0x1a   :  { %31 = vsyncpa [#allocation8], 0 }
  0x1b   :  { %32 = vsyncpa [#allocation11], 0 }
  0x1c   :  { %33 = vsyncpa [#allocation14], 0 }
  0x1d   :  { %34 = vsyncpa [#allocation17], 0 }
  0x1e   :  { %35 = vsyncpa [#allocation20], 0 }
  0x1f   :  { %36 = vsyncpa [#allocation23], 0 }
  0x20   :  { %37 = vsyncpa [#allocation26], 0 }
  0x21   :  { %38 = vsyncpa [#allocation29], 0 }
  0x22   :  { %39 = vsyncpa [#allocation32], 0 }
  0x23   :  { %41 = vsyncpa [#allocation32 + $0x1], 0 }
  0x24   :  { %42 = vsyncpa [#allocation35], 0 }
  0x25   :  { %44 = vsyncpa [#allocation35 + $0x1], 0 }
  0x26   :  { %45 = vsyncpa [#allocation38], 0 }
  0x27   :  { %47 = vsyncpa [#allocation38 + $0x1], 0 }
  0x28   :  { %48 = vsyncpa [#allocation6], 0 }
  0x29   :  { %49 = vsyncpa [#allocation42], 0  ;;  %s4606_s5 = smov 0   ;;  %s4608_s26 = smov 0  }
  0x2a   :  { %s4610_s27 = smov 0   ;;  %s4612_s28 = smov 0  }
  0x2b LB: > { %5509 = sst [smem:[#allocation57_spill]] %s4440_s27  ;;  %s4627_s6 = sadd.s32 4294967295, %s4444_s28   ;;  %s4444_s28 = sphi %s4612_s28, %s5585_s28   ;;  %s4440_s27 = sphi %s4610_s27, %s5582_s27   ;;  %s4436_s26 = sphi %s4608_s26, %s5584_s26   ;;  %s4432_s5 = sphi %s4606_s5, %s5583_s5  }
  0x2c   : > { %p2574_p0 = scmp.ge.s32.totalorder %s4444_s28, 1  ;;  %p5461_p1 = scmp.eq.s32.totalorder %s4627_s6, 0 }
  0x2d   : > { %p615_p2 = scmp.lt.s32.totalorder %s4444_s28, 3  ;;  %s4446_s29 = smov [#allocation7]  }
  0x2e   : > { %s640_s0 = sshll.u32 %s4446_s29, 4  ;;  %s4447_s7 = smov [#allocation10]   ;;  %s4637_s0 = int_to_ptr.vmem [resolvable:$true] %s640_s0 }
  0x2f   : > { %p4633_p4 = pnand %p2574_p0, %p615_p2  ;;  %s667_s30 = sshll.u32 %s4447_s7, 4  ;;  %s4647_s30 = int_to_ptr.vmem [resolvable:$true] %s667_s30 }
  0x30   : > { %s4448_s25 = smov [#allocation13]   ;;  %s5513_s29 = sld [smem:[#allocation61_spill]] }
  0x31   : > { %s5510_s2 = scalar_select %p4633_p4, 1, 0 }
  0x32   : > { %p3474_p5 = pneg %p4633_p4  ;;  %s691_s8 = sshll.u32 %s4448_s25, 4  ;;  %s4649_s8 = int_to_ptr.vmem [resolvable:$true] %s691_s8 }
  0x33   : > { %5511 = sst [smem:[#allocation58_spill]] %s5510_s2 }
  0x34   : > { %p4643_p6 = pnand %p3474_p5, %p5461_p1 }
  0x36   : > { %s5512_s3 = scalar_select %p4643_p6, 1, 0 }
  0x37   : > { %s3650_s24 = scalar_lea.hbm %s5513_s29, 512  ;;  %p4659_p8 = pneg %p4643_p6 }
  0x38   : > { %p3651_p7 = scmp.ne.s32.totalorder %s5513_s29, %s3650_s24  ;;  %p3657_p11 = scmp.lt.u32.totalorder %s3650_s24, %s5513_s29 }
  0x39   : > { %s5514_s7 = scalar_select %p4659_p8, 1, 0 }
  0x3a   : > { %p3653_p9 = pnand %p4659_p8, %p3651_p7 }
  0x3c   : > { %p3654_p10 = pneg %p3653_p9 }
  0x3e   : > { %p3659_p12 = pnand %p3657_p11, %p3654_p10 }
  0x40   : > { %3662 = shalt.err (!%p3659_p12)
}
  0x41   : > { %s3663_s23 = scalar_lea.vmem %s4637_s0, 512  ;;  %p3671_p5 = scmp.lt.s32.totalorder %s4637_s0, %s4637_s0 }
  0x42   : > { %p3664_p13 = scmp.ne.s32.totalorder %s4637_s0, %s3663_s23  ;;  %p3672_p3 = scmp.lt.s32.totalorder %s3663_s23, %s3663_s23 }
  0x44   : > { %p3666_p0 = pnand %p3664_p13, %p4659_p8  ;;  %p3673_p7 = por %p3672_p3, %p3671_p5 }
  0x46   : > { %p3667_p2 = pneg %p3666_p0 }
  0x48   : > { %p3674_p9 = pnand %p3673_p7, %p3667_p2 }
  0x4a   : > { %3677 = shalt.err (!%p3674_p9)
}
  0x4b   : > { %s5456_s2 = smov 128   ;;  %s5458_s22 = smov 8  }
  0x4c   : > { %3480 = dma.hbm_to_vmem [thread:$0]  (!%p4643_p6), %s5513_s29, 512, %s4637_s0, [#allocation8], %s5456_s2, %s5456_s2, %s5458_s22  }
  0x4d   : > { %s5515_s20 = sld [smem:[#allocation63_spill]] }
  0x53   : > { %s3678_s23 = scalar_lea.hbm %s5515_s20, 16 }
  0x54   : > { %p3679_p3 = scmp.ne.s32.totalorder %s5515_s20, %s3678_s23  ;;  %p3685_p12 = scmp.lt.u32.totalorder %s3678_s23, %s5515_s20 }
  0x56   : > { %p3681_p10 = pnand %p3679_p3, %p4659_p8 }
  0x58   : > { %p3682_p11 = pneg %p3681_p10 }
  0x5a   : > { %p3687_p13 = pnand %p3685_p12, %p3682_p11 }
  0x5c   : > { %3690 = shalt.err (!%p3687_p13)
}
  0x5d   : > { %s3691_s0 = scalar_lea.vmem %s4647_s30, 16  ;;  %s3698_s16 = scalar_lea.vmem %s4647_s30, 32 }
  0x5e   : > { %p3692_p0 = scmp.ne.s32.totalorder %s4647_s30, %s3691_s0  ;;  %p3699_p7 = scmp.lt.s32.totalorder %s4647_s30, %s4647_s30 }
  0x5f   : > { %p3700_p9 = scmp.lt.s32.totalorder %s3698_s16, %s3691_s0 }
  0x60   : > { %p3694_p2 = pnand %p3692_p0, %p4659_p8 }
  0x61   : > { %p3701_p3 = por %p3700_p9, %p3699_p7 }
  0x62   : > { %p3695_p5 = pneg %p3694_p2 }
  0x64   : > { %p3702_p10 = pnand %p3701_p3, %p3695_p5 }
  0x66   : > { %3705 = shalt.err (!%p3702_p10)
}
  0x67   : > { %3486 = dma.hbm_to_vmem [thread:$0]  (!%p4643_p6), %s5515_s20, 16, %s4647_s30, [#allocation11]  }
  0x68   : > { %s5516_s4 = sld [smem:[#allocation65_spill]] }
  0x6e   : > { %s3706_s1 = scalar_lea.hbm %s5516_s4, 16 }
  0x6f   : > { %p3707_p11 = scmp.ne.s32.totalorder %s5516_s4, %s3706_s1  ;;  %p3713_p0 = scmp.lt.u32.totalorder %s3706_s1, %s5516_s4 }
  0x71   : > { %p3709_p12 = pnand %p3707_p11, %p4659_p8 }
  0x73   : > { %p3710_p13 = pneg %p3709_p12 }
  0x75   : > { %p3715_p2 = pnand %p3713_p0, %p3710_p13 }
  0x77   : > { %3718 = shalt.err (!%p3715_p2)
}
  0x78   : > { %s3719_s30 = scalar_lea.vmem %s4649_s8, 16  ;;  %s3726_s12 = scalar_lea.vmem %s4649_s8, 32 }
  0x79   : > { %p3720_p5 = scmp.ne.s32.totalorder %s4649_s8, %s3719_s30  ;;  %p3727_p3 = scmp.lt.s32.totalorder %s4649_s8, %s4649_s8 }
  0x7a   : > { %p3728_p10 = scmp.lt.s32.totalorder %s3726_s12, %s3719_s30 }
  0x7b   : > { %p3722_p7 = pnand %p3720_p5, %p4659_p8 }
  0x7c   : > { %p3729_p11 = por %p3728_p10, %p3727_p3 }
  0x7d   : > { %p3723_p9 = pneg %p3722_p7 }
  0x7f   : > { %p3730_p12 = pnand %p3729_p11, %p3723_p9 }
  0x81   : > { %3733 = shalt.err (!%p3730_p12)
}
  0x82   : > { %3492 = dma.hbm_to_vmem [thread:$0]  (!%p4643_p6), %s5516_s4, 16, %s4649_s8, [#allocation14]  }
  0x83   : > { %s4451_s24 = smov [#allocation16]   ;;  %s4452_s25 = smov [#allocation19]  }
  0x84   : > { %s715_s1 = sshll.u32 %s4451_s24, 4  ;;  %s739_s23 = sshll.u32 %s4452_s25, 4  ;;  %s716_s1 = int_to_ptr.vmem [resolvable:$true] %s715_s1  ;;  %s740_s23 = int_to_ptr.vmem [resolvable:$true] %s739_s23 }
  0x85   : > { %s5517_s2 = sld [smem:[#allocation67_spill]] }
  0x8b   : > { %s3734_s30 = scalar_lea.hbm %s5517_s2, 16 }
  0x8c   : > { %p3735_p13 = scmp.ne.s32.totalorder %s5517_s2, %s3734_s30  ;;  %p3741_p5 = scmp.lt.u32.totalorder %s3734_s30, %s5517_s2 }
  0x8e   : > { %p3737_p0 = pnand %p3735_p13, %p4659_p8 }
  0x90   : > { %p3738_p2 = pneg %p3737_p0 }
  0x92   : > { %p3743_p7 = pnand %p3741_p5, %p3738_p2 }
  0x94   : > { %3746 = shalt.err (!%p3743_p7)
}
  0x95   : > { %s3747_s8 = scalar_lea.vmem %s716_s1, 16  ;;  %s3754_s18 = scalar_lea.vmem %s716_s1, 32 }
  0x96   : > { %p3748_p9 = scmp.ne.s32.totalorder %s716_s1, %s3747_s8  ;;  %p3755_p11 = scmp.lt.s32.totalorder %s716_s1, %s716_s1 }
  0x97   : > { %p3756_p12 = scmp.lt.s32.totalorder %s3754_s18, %s3747_s8 }
  0x98   : > { %p3750_p3 = pnand %p3748_p9, %p4659_p8 }
  0x99   : > { %p3757_p1 = por %p3756_p12, %p3755_p11 }
  0x9a   : > { %p3751_p10 = pneg %p3750_p3 }
  0x9c   : > { %p3758_p4 = pnand %p3757_p1, %p3751_p10 }
  0x9e   : > { %3761 = shalt.err (!%p3758_p4)
}
  0x9f   : > { %3498 = dma.hbm_to_vmem [thread:$0]  (!%p4643_p6), %s5517_s2, 16, %s716_s1, [#allocation17]  }
  0xa0   : > { %s5518_s9 = sld [smem:[#allocation69_spill]] }
  0xa6   : > { %s3762_s0 = scalar_lea.hbm %s5518_s9, 16 }
  0xa7   : > { %p3763_p13 = scmp.ne.s32.totalorder %s5518_s9, %s3762_s0  ;;  %p3769_p4 = scmp.lt.u32.totalorder %s3762_s0, %s5518_s9 }
  0xa9   : > { %p3765_p0 = pnand %p3763_p13, %p4659_p8 }
  0xab   : > { %p3766_p1 = pneg %p3765_p0 }
  0xad   : > { %p3771_p2 = pnand %p3769_p4, %p3766_p1 }
  0xaf   : > { %3774 = shalt.err (!%p3771_p2)
}
  0xb0   : > { %s3775_s8 = scalar_lea.vmem %s740_s23, 16  ;;  %s3782_s1 = scalar_lea.vmem %s740_s23, 32 }
  0xb1   : > { %p3776_p5 = scmp.ne.s32.totalorder %s740_s23, %s3775_s8  ;;  %p3783_p3 = scmp.lt.s32.totalorder %s740_s23, %s740_s23 }
  0xb2   : > { %p3784_p10 = scmp.lt.s32.totalorder %s3782_s1, %s3775_s8 }
  0xb3   : > { %p3778_p7 = pnand %p3776_p5, %p4659_p8 }
  0xb4   : > { %p3785_p11 = por %p3784_p10, %p3783_p3 }
  0xb5   : > { %p3779_p9 = pneg %p3778_p7 }
  0xb7   : > { %p3786_p12 = pnand %p3785_p11, %p3779_p9 }
  0xb9   : > { %3789 = shalt.err (!%p3786_p12)
}
  0xba   : > { %3504 = dma.hbm_to_vmem [thread:$0]  (!%p4643_p6), %s5518_s9, 16, %s740_s23, [#allocation20]  }
  0xbb   : > { %s4453_s24 = smov [#allocation22]   ;;  %s4454_s25 = smov [#allocation25]  }
  0xbc   : > { %s763_s20 = sshll.u32 %s4453_s24, 4  ;;  %s787_s0 = sshll.u32 %s4454_s25, 4  ;;  %s764_s20 = int_to_ptr.vmem [resolvable:$true] %s763_s20  ;;  %s788_s0 = int_to_ptr.vmem [resolvable:$true] %s787_s0 }
  0xbd   : > { %s5519_s11 = sld [smem:[#allocation71_spill]] }
  0xc3   : > { %s3790_s12 = scalar_lea.hbm %s5519_s11, 16 }
  0xc4   : > { %p3791_p13 = scmp.ne.s32.totalorder %s5519_s11, %s3790_s12  ;;  %p3797_p4 = scmp.lt.u32.totalorder %s3790_s12, %s5519_s11 }
  0xc6   : > { %p3793_p0 = pnand %p3791_p13, %p4659_p8 }
  0xc8   : > { %p3794_p1 = pneg %p3793_p0 }
  0xca   : > { %p3799_p2 = pnand %p3797_p4, %p3794_p1 }
  0xcc   : > { %3802 = shalt.err (!%p3799_p2)
}
  0xcd   : > { %s3803_s23 = scalar_lea.vmem %s764_s20, 16  ;;  %s3810_s22 = scalar_lea.vmem %s764_s20, 32 }
  0xce   : > { %p3804_p5 = scmp.ne.s32.totalorder %s764_s20, %s3803_s23  ;;  %p3811_p3 = scmp.lt.s32.totalorder %s764_s20, %s764_s20 }
  0xcf   : > { %p3812_p10 = scmp.lt.s32.totalorder %s3810_s22, %s3803_s23 }
  0xd0   : > { %p3806_p7 = pnand %p3804_p5, %p4659_p8 }
  0xd1   : > { %p3813_p11 = por %p3812_p10, %p3811_p3 }
  0xd2   : > { %p3807_p9 = pneg %p3806_p7 }
  0xd4   : > { %p3814_p12 = pnand %p3813_p11, %p3807_p9 }
  0xd6   : > { %3817 = shalt.err (!%p3814_p12)
}
  0xd7   : > { %3510 = dma.hbm_to_vmem [thread:$0]  (!%p4643_p6), %s5519_s11, 16, %s764_s20, [#allocation23]  }
  0xd8   : > { %s5520_s13 = sld [smem:[#allocation73_spill]] }
  0xde   : > { %s3818_s12 = scalar_lea.hbm %s5520_s13, 16 }
  0xdf   : > { %p3819_p13 = scmp.ne.s32.totalorder %s5520_s13, %s3818_s12  ;;  %p3825_p4 = scmp.lt.u32.totalorder %s3818_s12, %s5520_s13 }
  0xe1   : > { %p3821_p0 = pnand %p3819_p13, %p4659_p8 }
  0xe3   : > { %p3822_p1 = pneg %p3821_p0 }
  0xe5   : > { %p3827_p2 = pnand %p3825_p4, %p3822_p1 }
  0xe7   : > { %3830 = shalt.err (!%p3827_p2)
}
  0xe8   : > { %s3831_s23 = scalar_lea.vmem %s788_s0, 16  ;;  %s3838_s20 = scalar_lea.vmem %s788_s0, 32 }
  0xe9   : > { %p3832_p5 = scmp.ne.s32.totalorder %s788_s0, %s3831_s23  ;;  %p3839_p3 = scmp.lt.s32.totalorder %s788_s0, %s788_s0 }
  0xea   : > { %p3840_p10 = scmp.lt.s32.totalorder %s3838_s20, %s3831_s23 }
  0xeb   : > { %p3834_p7 = pnand %p3832_p5, %p4659_p8 }
  0xec   : > { %p3841_p11 = por %p3840_p10, %p3839_p3 }
  0xed   : > { %p3835_p9 = pneg %p3834_p7 }
  0xef   : > { %p3842_p12 = pnand %p3841_p11, %p3835_p9 }
  0xf1   : > { %3845 = shalt.err (!%p3842_p12)
}
  0xf2   : > { %3516 = dma.hbm_to_vmem [thread:$0]  (!%p4643_p6), %s5520_s13, 16, %s788_s0, [#allocation26]  }
  0xf3   : > { %s4455_s25 = smov [#allocation28]   ;;  %s5521_s15 = sld [smem:[#allocation75_spill]] }
  0xf4   : > { %s810_s16 = sshll.u32 %s4455_s25, 4  ;;  %s811_s16 = int_to_ptr.vmem [resolvable:$true] %s810_s16 }
  0xf9   : > { %s3846_s14 = scalar_lea.hbm %s5521_s15, 128 }
  0xfa   : > { %p3847_p13 = scmp.ne.s32.totalorder %s5521_s15, %s3846_s14  ;;  %p3853_p4 = scmp.lt.u32.totalorder %s3846_s14, %s5521_s15 }
  0xfc   : > { %p3849_p0 = pnand %p3847_p13, %p4659_p8 }
  0xfe   : > { %p3850_p1 = pneg %p3849_p0 }
 0x100   : > { %p3855_p2 = pnand %p3853_p4, %p3850_p1 }
 0x102   : > { %3858 = shalt.err (!%p3855_p2)
}
 0x103   : > { %s3859_s0 = scalar_lea.vmem %s811_s16, 128  ;;  %p3867_p3 = scmp.lt.s32.totalorder %s811_s16, %s811_s16 }
 0x104   : > { %p3860_p5 = scmp.ne.s32.totalorder %s811_s16, %s3859_s0  ;;  %p3868_p10 = scmp.lt.s32.totalorder %s3859_s0, %s3859_s0 }
 0x106   : > { %p3862_p7 = pnand %p3860_p5, %p4659_p8  ;;  %p3869_p11 = por %p3868_p10, %p3867_p3 }
 0x108   : > { %p3863_p9 = pneg %p3862_p7 }
 0x10a   : > { %p3870_p12 = pnand %p3869_p11, %p3863_p9 }
 0x10c   : > { %3873 = shalt.err (!%p3870_p12)
}
 0x10d   : > { %s5463_s20 = smov 64   ;;  %s5464_s22 = smov 4  }
 0x10e   : > { %3522 = dma.hbm_to_vmem [thread:$0]  (!%p4643_p6), %s5521_s15, 128, %s811_s16, [#allocation29], %s5463_s20, %s5463_s20, %s5464_s22  }
 0x10f   : > { %s4825_s30 = sadd.s32 1, %s4444_s28   ;;  %s419_s12 = sadd.s32 1, %s4440_s27 }
 0x110   : > { %s416_s14 = ssub.s32 %s4444_s28, %s4825_s30  ;;  %p426_p13 = scmp.ne.s32.totalorder %s4440_s27, %s4436_s26 }
 0x111   : > { %p417_p0 = scmp.eq.s32.totalorder %s416_s14, 0  ;;  %p427_p1 = scmp.eq.s32.totalorder %s4444_s28, 0 }
 0x112   : > { %p432_p4 = scmp.ne.s32.totalorder %s4436_s26, %s4432_s5  ;;  %p3562_p2 = scmp.lt.s32.totalorder %s4444_s28, 2 }
 0x113   : > { %s4837_s8 = scalar_select %p417_p0, %s4440_s27, %s419_s12  }
 0x114   : > { %p428_p5 = por %p427_p1, %p426_p13  ;;  %p5523_p7 = scmp.eq.s32.totalorder %s4627_s6, 0 }
 0x115   : > { %5522 = sst [smem:[#allocation59_spill]] %s4837_s8  ;;  %s4846_s18 = sand.u32 1, %s4444_s28  }
 0x116   : > { %p4841_p9 = por %p5523_p7, %p432_p4  ;;  %s4849_s16 = sand.u32 1, %s4440_s27  }
 0x117   : > { %s5467_s23 = sshll.u32 %s4849_s16, 7  ;;  %s2649_s0 = sshll.u32 %s4444_s28, 11 }
 0x118   : > { %s5524_s1 = scalar_select %p4841_p9, 1, 0 }
 0x119   : > { %s5525_s17 = sld [smem:[#allocation77_spill]]  ;;  %s839_s12 = scalar_lea.vmem [#allocation31], %s5467_s23 }
 0x11a   : > { %s846_s14 = sshll.u32 %s839_s12, 4  ;;  %p4862_p3 = pnand %p3562_p2, %p428_p5  ;;  %s4860_s14 = int_to_ptr.vmem [resolvable:$true] %s846_s14 }
 0x11b   : > { %s5527_s19 = sld [smem:[#allocation79_spill]]  ;;  %s5479_s5 = scalar_lea.sflag [#allocation32], %s4846_s18 }
 0x11c   : > { %s5526_s20 = scalar_select %p4862_p3, 1, 0 }
 0x11d   : > { %p4876_p11 = pneg %p4862_p3 }
 0x11f   : > { %s4856_s25 = scalar_lea.hbm %s5525_s17, %s2649_s0  ;;  %s3879_s11 = scalar_lea.hbm %s5525_s17, 4096 }
 0x120   : > { %s3874_s4 = scalar_lea.hbm %s4856_s25, 2048  ;;  %p3880_p0 = scmp.lt.u32.totalorder %s4856_s25, %s5525_s17 }
 0x121   : > { %s4869_s24 = scalar_lea.hbm %s5527_s19, %s2649_s0  ;;  %p3875_p10 = scmp.ne.s32.totalorder %s4856_s25, %s3874_s4 }
 0x122   : > { %s5528_s9 = scalar_select %p4876_p11, 1, 0 }
 0x123   : > { %p3877_p12 = pnand %p4876_p11, %p3875_p10  ;;  %p3881_p1 = scmp.lt.u32.totalorder %s3879_s11, %s3874_s4 }
 0x124   : > { %p3883_p2 = scmp.lt.u32.totalorder %s3874_s4, %s4856_s25 }
 0x125   : > { %p3878_p13 = pneg %p3877_p12  ;;  %p3882_p4 = por %p3881_p1, %p3880_p0 }
 0x127   : > { %p3884_p5 = por %p3883_p2, %p3882_p4 }
 0x129   : > { %p3885_p7 = pnand %p3884_p5, %p3878_p13 }
 0x12b   : > { %3888 = shalt.err (!%p3885_p7)
}
 0x12c   : > { %s3889_s0 = scalar_lea.vmem %s4860_s14, 2048  ;;  %s4458_s23 = smov [#allocation31]  }
 0x12d   : > { %p3890_p10 = scmp.ne.s32.totalorder %s4860_s14, %s3889_s0  ;;  %s3894_s12 = sshll.u32 %s4458_s23, 4  ;;  %s3895_s12 = int_to_ptr.vmem [resolvable:$false] %s3894_s12 }
 0x12e   : > { %s3896_s2 = scalar_lea.vmem %s3895_s12, 4096  ;;  %p3897_p6 = scmp.lt.s32.totalorder %s4860_s14, %s3895_s12 }
 0x12f   : > { %p3892_p12 = pnand %p3890_p10, %p4876_p11  ;;  %p3898_p8 = scmp.lt.s32.totalorder %s3896_s2, %s3889_s0 }
 0x131   : > { %p3893_p9 = pneg %p3892_p12  ;;  %p3899_p0 = por %p3898_p8, %p3897_p6 }
 0x133   : > { %p3900_p1 = pnand %p3899_p0, %p3893_p9 }
 0x135   : > { %3903 = shalt.err (!%p3900_p1)
}
 0x136   : > { %s5529_s11 = smov 8   ;;  %s5530_s4 = smov 128  }
 0x137   : > { %3529 = dma.hbm_to_vmem [thread:$0]  (!%p4862_p3), %s4856_s25, 2048, %s4860_s14, %s5479_s5, %s5530_s4, %s5530_s4, %s5529_s11  }
 0x138   : > { %s5531_s22 = sshll.u32 %s4849_s16, 7  ;;  %s4907_s12 = sshll.u32 %s4444_s28, 4 }
 0x139   : > { %s877_s0 = scalar_lea.vmem [#allocation34], %s5531_s22  ;;  %s5478_s2 = scalar_lea.sflag [#allocation35], %s4846_s18 }
 0x13a   : > { %s884_s23 = sshll.u32 %s877_s0, 4  ;;  %s3904_s13 = scalar_lea.hbm %s4869_s24, 2048  ;;  %s4909_s23 = int_to_ptr.vmem [resolvable:$true] %s884_s23 }
 0x13b   : > { %p3905_p6 = scmp.ne.s32.totalorder %s4869_s24, %s3904_s13  ;;  %s3909_s29 = scalar_lea.hbm %s5527_s19, 4096 }
 0x13c   : > { %p3910_p13 = scmp.lt.u32.totalorder %s4869_s24, %s5527_s19  ;;  %p3911_p4 = scmp.lt.u32.totalorder %s3909_s29, %s3904_s13 }
 0x13d   : > { %p3907_p8 = pnand %p3905_p6, %p4876_p11  ;;  %p3913_p5 = scmp.lt.u32.totalorder %s3904_s13, %s4869_s24 }
 0x13e   : > { %p3912_p2 = por %p3911_p4, %p3910_p13 }
 0x13f   : > { %p3908_p9 = pneg %p3907_p8 }
 0x140   : > { %p3914_p7 = por %p3913_p5, %p3912_p2 }
 0x142   : > { %p3915_p10 = pnand %p3914_p7, %p3908_p9 }
 0x144   : > { %3918 = shalt.err (!%p3915_p10)
}
 0x145   : > { %s3919_s28 = scalar_lea.vmem %s4909_s23, 2048  ;;  %s4459_s15 = smov [#allocation34]  }
 0x146   : > { %p3920_p12 = scmp.ne.s32.totalorder %s4909_s23, %s3919_s28  ;;  %s3924_s17 = sshll.u32 %s4459_s15, 4  ;;  %s3925_s17 = int_to_ptr.vmem [resolvable:$false] %s3924_s17 }
 0x147   : > { %s3926_s27 = scalar_lea.vmem %s3925_s17, 4096  ;;  %p3927_p6 = scmp.lt.s32.totalorder %s4909_s23, %s3925_s17 }
 0x148   : > { %p3922_p0 = pnand %p3920_p12, %p4876_p11  ;;  %p3928_p8 = scmp.lt.s32.totalorder %s3926_s27, %s3919_s28 }
 0x14a   : > { %p3923_p1 = pneg %p3922_p0  ;;  %p3929_p13 = por %p3928_p8, %p3927_p6 }
 0x14c   : > { %p3930_p4 = pnand %p3929_p13, %p3923_p1 }
 0x14e   : > { %3933 = shalt.err (!%p3930_p4)
}
 0x14f   : > { %3535 = dma.hbm_to_vmem [thread:$0]  (!%p4862_p3), %s4869_s24, 2048, %s4909_s23, %s5478_s2, %s5530_s4, %s5530_s4, %s5529_s11  }
 0x150   : > { %s4942_s8 = scalar_lea.hbm %s5434_s21, %s4907_s12  ;;  %s914_s25 = scalar_lea.vmem [#allocation37], %s4849_s16 }
 0x151   : > { %s921_s14 = sshll.u32 %s914_s25, 4  ;;  %s4460_s22 = smov [#allocation4]   ;;  %s4945_s14 = int_to_ptr.vmem [resolvable:$true] %s921_s14 }
 0x152   : > { %s4947_s0 = sshll.u32 %s4460_s22, 4  ;;  %s5477_s28 = scalar_lea.sflag [#allocation38], %s4846_s18  ;;  %s628_s0 = int_to_ptr.vmem [resolvable:$true] %s4947_s0 }
 0x153   : > { %s3934_s15 = scalar_lea.hbm %s4942_s8, 16  ;;  %s3939_s17 = scalar_lea.hbm %s5434_s21, 32 }
 0x154   : > { %p3935_p9 = scmp.ne.s32.totalorder %s4942_s8, %s3934_s15  ;;  %p3940_p7 = scmp.lt.u32.totalorder %s4942_s8, %s5434_s21 }
 0x155   : > { %p3941_p10 = scmp.lt.u32.totalorder %s3939_s17, %s3934_s15  ;;  %p3943_p0 = scmp.lt.u32.totalorder %s3934_s15, %s4942_s8 }
 0x156   : > { %p3937_p2 = pnand %p3935_p9, %p4876_p11 }
 0x157   : > { %p3942_p12 = por %p3941_p10, %p3940_p7 }
 0x158   : > { %p3938_p5 = pneg %p3937_p2 }
 0x159   : > { %p3944_p1 = por %p3943_p0, %p3942_p12 }
 0x15b   : > { %p3945_p6 = pnand %p3944_p1, %p3938_p5 }
 0x15d   : > { %3948 = shalt.err (!%p3945_p6)
}
 0x15e   : > { %s3949_s29 = scalar_lea.vmem %s4945_s14, 16  ;;  %s4461_s25 = smov [#allocation37]  }
 0x15f   : > { %p3950_p8 = scmp.ne.s32.totalorder %s4945_s14, %s3949_s29  ;;  %s3954_s22 = sshll.u32 %s4461_s25, 4  ;;  %s3955_s22 = int_to_ptr.vmem [resolvable:$false] %s3954_s22 }
 0x160   : > { %s3956_s24 = scalar_lea.vmem %s3955_s22, 32  ;;  %p3957_p9 = scmp.lt.s32.totalorder %s4945_s14, %s3955_s22 }
 0x161   : > { %p3952_p13 = pnand %p3950_p8, %p4876_p11  ;;  %p3958_p2 = scmp.lt.s32.totalorder %s3956_s24, %s3949_s29 }
 0x163   : > { %p3953_p4 = pneg %p3952_p13  ;;  %p3959_p7 = por %p3958_p2, %p3957_p9 }
 0x165   : > { %p3960_p10 = pnand %p3959_p7, %p3953_p4 }
 0x167   : > { %3963 = shalt.err (!%p3960_p10)
}
 0x168   : > { %3541 = dma.hbm_to_vmem [thread:$0]  (!%p4862_p3), %s4942_s8, 16, %s4945_s14, %s5477_s28  }
 0x169   : > { %s5532_s17 = sld [smem:[#allocation60_spill]]  ;;  %p5533_p12 = scmp.ne.s32.totalorder %s5514_s7, 0 }
 0x16f   : > { %s3964_s27 = scalar_lea.hbm %s5532_s17, 256 }
 0x170   : > { %p3965_p5 = scmp.ne.s32.totalorder %s5532_s17, %s3964_s27  ;;  %p3971_p6 = scmp.lt.u32.totalorder %s3964_s27, %s5532_s17 }
 0x172   : > { %p3967_p0 = pnand %p3965_p5, %p5533_p12 }
 0x174   : > { %p3968_p1 = pneg %p3967_p0 }
 0x176   : > { %p3973_p8 = pnand %p3971_p6, %p3968_p1 }
 0x178   : > { %3976 = shalt.err (!%p3973_p8)
}
 0x179   : > { %s3977_s24 = scalar_lea.vmem %s628_s0, 256  ;;  %p3985_p2 = scmp.lt.s32.totalorder %s628_s0, %s628_s0 }
 0x17a   : > { %p3978_p13 = scmp.ne.s32.totalorder %s628_s0, %s3977_s24  ;;  %p3986_p7 = scmp.lt.s32.totalorder %s3977_s24, %s3977_s24 }
 0x17c   : > { %p3980_p4 = pnand %p3978_p13, %p5533_p12  ;;  %p3987_p10 = por %p3986_p7, %p3985_p2 }
 0x17e   : > { %p3981_p9 = pneg %p3980_p4 }
 0x180   : > { %p3988_p3 = pnand %p3987_p10, %p3981_p9 }
 0x182   : > { %3991 = shalt.err (!%p3988_p3)
}
 0x183   : > { %p5534_p5 = scmp.ne.s32.totalorder %s5512_s3, 0  ;;  %s4462_s15 = smov [#allocation9]  }
 0x184   : > { %s653_s23 = sshll.u32 %s4462_s15, 4  ;;  %s4463_s27 = smov [#allocation12]   ;;  %s654_s23 = int_to_ptr.vmem [resolvable:$true] %s653_s23 }
 0x185   : > { %3477 = dma.hbm_to_vmem [thread:$0]  (!%p5534_p5), %s5532_s17, 256, %s628_s0, [#allocation5], %s5530_s4, %s5530_s4, %s5529_s11  }
 0x186   : > { %s677_s13 = sshll.u32 %s4463_s27, 4  ;;  %s5535_s22 = sld [smem:[#allocation62_spill]]  ;;  %s678_s13 = int_to_ptr.vmem [resolvable:$true] %s677_s13 }
 0x18c   : > { %s3992_s24 = scalar_lea.hbm %s5535_s22, 2048 }
 0x18d   : > { %p3993_p3 = scmp.ne.s32.totalorder %s5535_s22, %s3992_s24  ;;  %p3999_p6 = scmp.lt.u32.totalorder %s3992_s24, %s5535_s22 }
 0x18f   : > { %p3995_p0 = pnand %p3993_p3, %p5533_p12 }
 0x191   : > { %p3996_p1 = pneg %p3995_p0 }
 0x193   : > { %p4001_p8 = pnand %p3999_p6, %p3996_p1 }
 0x195   : > { %4004 = shalt.err (!%p4001_p8)
}
 0x196   : > { %s4005_s0 = scalar_lea.vmem %s654_s23, 2048  ;;  %p4013_p2 = scmp.lt.s32.totalorder %s654_s23, %s654_s23 }
 0x197   : > { %p4006_p13 = scmp.ne.s32.totalorder %s654_s23, %s4005_s0  ;;  %p4014_p7 = scmp.lt.s32.totalorder %s4005_s0, %s4005_s0 }
 0x199   : > { %p4008_p4 = pnand %p4006_p13, %p5533_p12  ;;  %p4015_p10 = por %p4014_p7, %p4013_p2 }
 0x19b   : > { %p4009_p9 = pneg %p4008_p4 }
 0x19d   : > { %p4016_p11 = pnand %p4015_p10, %p4009_p9 }
 0x19f   : > { %4019 = shalt.err (!%p4016_p11)
}
 0x1a0   : > { %3483 = dma.hbm_to_vmem [thread:$0]  (!%p5534_p5), %s5535_s22, 2048, %s654_s23, [#allocation8], %s5530_s4, %s5530_s4, %s5529_s11  }
 0x1a1   : > { %s5536_s15 = sld [smem:[#allocation64_spill]] }
 0x1a7   : > { %s4020_s27 = scalar_lea.hbm %s5536_s15, 2048 }
 0x1a8   : > { %p4021_p3 = scmp.ne.s32.totalorder %s5536_s15, %s4020_s27  ;;  %p4027_p1 = scmp.lt.u32.totalorder %s4020_s27, %s5536_s15 }
 0x1aa   : > { %p4023_p11 = pnand %p4021_p3, %p5533_p12 }
 0x1ac   : > { %p4024_p0 = pneg %p4023_p11 }
 0x1ae   : > { %p4029_p6 = pnand %p4027_p1, %p4024_p0 }
 0x1b0   : > { %4032 = shalt.err (!%p4029_p6)
}
 0x1b1   : > { %s4033_s0 = scalar_lea.vmem %s678_s13, 2048  ;;  %p4041_p9 = scmp.lt.s32.totalorder %s678_s13, %s678_s13 }
 0x1b2   : > { %p4034_p8 = scmp.ne.s32.totalorder %s678_s13, %s4033_s0  ;;  %p4042_p2 = scmp.lt.s32.totalorder %s4033_s0, %s4033_s0 }
 0x1b4   : > { %p4036_p13 = pnand %p4034_p8, %p5533_p12  ;;  %p4043_p7 = por %p4042_p2, %p4041_p9 }
 0x1b6   : > { %p4037_p4 = pneg %p4036_p13 }
 0x1b8   : > { %p4044_p10 = pnand %p4043_p7, %p4037_p4 }
 0x1ba   : > { %4047 = shalt.err (!%p4044_p10)
}
 0x1bb   : > { %3489 = dma.hbm_to_vmem [thread:$0]  (!%p5534_p5), %s5536_s15, 2048, %s678_s13, [#allocation11], %s5530_s4, %s5530_s4, %s5529_s11  }
 0x1bc   : > { %s4464_s2 = smov [#allocation15]   ;;  %s4465_s14 = smov [#allocation18]  }
 0x1bd   : > { %s701_s28 = sshll.u32 %s4464_s2, 4  ;;  %s725_s27 = sshll.u32 %s4465_s14, 4  ;;  %s702_s28 = int_to_ptr.vmem [resolvable:$true] %s701_s28  ;;  %s726_s27 = int_to_ptr.vmem [resolvable:$true] %s725_s27 }
 0x1be   : > { %s5537_s24 = sld [smem:[#allocation66_spill]] }
 0x1c4   : > { %s4048_s8 = scalar_lea.hbm %s5537_s24, 2048 }
 0x1c5   : > { %p4049_p3 = scmp.ne.s32.totalorder %s5537_s24, %s4048_s8  ;;  %p4055_p1 = scmp.lt.u32.totalorder %s4048_s8, %s5537_s24 }
 0x1c7   : > { %p4051_p11 = pnand %p4049_p3, %p5533_p12 }
 0x1c9   : > { %p4052_p0 = pneg %p4051_p11 }
 0x1cb   : > { %p4057_p6 = pnand %p4055_p1, %p4052_p0 }
 0x1cd   : > { %4060 = shalt.err (!%p4057_p6)
}
 0x1ce   : > { %s4061_s13 = scalar_lea.vmem %s702_s28, 2048  ;;  %p4069_p9 = scmp.lt.s32.totalorder %s702_s28, %s702_s28 }
 0x1cf   : > { %p4062_p8 = scmp.ne.s32.totalorder %s702_s28, %s4061_s13  ;;  %p4070_p2 = scmp.lt.s32.totalorder %s4061_s13, %s4061_s13 }
 0x1d1   : > { %p4064_p13 = pnand %p4062_p8, %p5533_p12  ;;  %p4071_p7 = por %p4070_p2, %p4069_p9 }
 0x1d3   : > { %p4065_p4 = pneg %p4064_p13 }
 0x1d5   : > { %p4072_p10 = pnand %p4071_p7, %p4065_p4 }
 0x1d7   : > { %4075 = shalt.err (!%p4072_p10)
}
 0x1d8   : > { %3495 = dma.hbm_to_vmem [thread:$0]  (!%p5534_p5), %s5537_s24, 2048, %s702_s28, [#allocation14], %s5530_s4, %s5530_s4, %s5529_s11  }
 0x1d9   : > { %s5538_s14 = sld [smem:[#allocation68_spill]] }
 0x1df   : > { %s4076_s25 = scalar_lea.hbm %s5538_s14, 2048 }
 0x1e0   : > { %p4077_p3 = scmp.ne.s32.totalorder %s5538_s14, %s4076_s25  ;;  %p4083_p1 = scmp.lt.u32.totalorder %s4076_s25, %s5538_s14 }
 0x1e2   : > { %p4079_p11 = pnand %p4077_p3, %p5533_p12 }
 0x1e4   : > { %p4080_p0 = pneg %p4079_p11 }
 0x1e6   : > { %p4085_p6 = pnand %p4083_p1, %p4080_p0 }
 0x1e8   : > { %4088 = shalt.err (!%p4085_p6)
}
 0x1e9   : > { %s4089_s13 = scalar_lea.vmem %s726_s27, 2048  ;;  %p4097_p9 = scmp.lt.s32.totalorder %s726_s27, %s726_s27 }
 0x1ea   : > { %p4090_p8 = scmp.ne.s32.totalorder %s726_s27, %s4089_s13  ;;  %p4098_p2 = scmp.lt.s32.totalorder %s4089_s13, %s4089_s13 }
 0x1ec   : > { %p4092_p13 = pnand %p4090_p8, %p5533_p12  ;;  %p4099_p7 = por %p4098_p2, %p4097_p9 }
 0x1ee   : > { %p4093_p4 = pneg %p4092_p13 }
 0x1f0   : > { %p4100_p10 = pnand %p4099_p7, %p4093_p4 }
 0x1f2   : > { %4103 = shalt.err (!%p4100_p10)
}
 0x1f3   : > { %3501 = dma.hbm_to_vmem [thread:$0]  (!%p5534_p5), %s5538_s14, 2048, %s726_s27, [#allocation17], %s5530_s4, %s5530_s4, %s5529_s11  }
 0x1f4   : > { %s4466_s17 = smov [#allocation21]   ;;  %s4467_s2 = smov [#allocation24]  }
 0x1f5   : > { %s749_s5 = sshll.u32 %s4466_s17, 4  ;;  %s773_s25 = sshll.u32 %s4467_s2, 4  ;;  %s750_s5 = int_to_ptr.vmem [resolvable:$true] %s749_s5  ;;  %s774_s25 = int_to_ptr.vmem [resolvable:$true] %s773_s25 }
 0x1f6   : > { %s5539_s10 = sld [smem:[#allocation70_spill]] }
 0x1fc   : > { %s4104_s0 = scalar_lea.hbm %s5539_s10, 2048 }
 0x1fd   : > { %p4105_p3 = scmp.ne.s32.totalorder %s5539_s10, %s4104_s0  ;;  %p4111_p1 = scmp.lt.u32.totalorder %s4104_s0, %s5539_s10 }
 0x1ff   : > { %p4107_p11 = pnand %p4105_p3, %p5533_p12 }
 0x201   : > { %p4108_p0 = pneg %p4107_p11 }
 0x203   : > { %p4113_p6 = pnand %p4111_p1, %p4108_p0 }
 0x205   : > { %4116 = shalt.err (!%p4113_p6)
}
 0x206   : > { %s4117_s27 = scalar_lea.vmem %s750_s5, 2048  ;;  %p4125_p9 = scmp.lt.s32.totalorder %s750_s5, %s750_s5 }
 0x207   : > { %p4118_p8 = scmp.ne.s32.totalorder %s750_s5, %s4117_s27  ;;  %p4126_p2 = scmp.lt.s32.totalorder %s4117_s27, %s4117_s27 }
 0x209   : > { %p4120_p13 = pnand %p4118_p8, %p5533_p12  ;;  %p4127_p7 = por %p4126_p2, %p4125_p9 }
 0x20b   : > { %p4121_p4 = pneg %p4120_p13 }
 0x20d   : > { %p4128_p10 = pnand %p4127_p7, %p4121_p4 }
 0x20f   : > { %4131 = shalt.err (!%p4128_p10)
}
 0x210   : > { %3507 = dma.hbm_to_vmem [thread:$0]  (!%p5534_p5), %s5539_s10, 2048, %s750_s5, [#allocation20], %s5530_s4, %s5530_s4, %s5529_s11  }
 0x211   : > { %s5540_s29 = sld [smem:[#allocation72_spill]] }
 0x217   : > { %s4132_s8 = scalar_lea.hbm %s5540_s29, 2048 }
 0x218   : > { %p4133_p3 = scmp.ne.s32.totalorder %s5540_s29, %s4132_s8  ;;  %p4139_p1 = scmp.lt.u32.totalorder %s4132_s8, %s5540_s29 }
 0x21a   : > { %p4135_p11 = pnand %p4133_p3, %p5533_p12 }
 0x21c   : > { %p4136_p0 = pneg %p4135_p11 }
 0x21e   : > { %p4141_p6 = pnand %p4139_p1, %p4136_p0 }
 0x220   : > { %4144 = shalt.err (!%p4141_p6)
}
 0x221   : > { %s4145_s27 = scalar_lea.vmem %s774_s25, 2048  ;;  %p4153_p9 = scmp.lt.s32.totalorder %s774_s25, %s774_s25 }
 0x222   : > { %p4146_p8 = scmp.ne.s32.totalorder %s774_s25, %s4145_s27  ;;  %p4154_p2 = scmp.lt.s32.totalorder %s4145_s27, %s4145_s27 }
 0x224   : > { %p4148_p13 = pnand %p4146_p8, %p5533_p12  ;;  %p4155_p7 = por %p4154_p2, %p4153_p9 }
 0x226   : > { %p4149_p4 = pneg %p4148_p13 }
 0x228   : > { %p4156_p10 = pnand %p4155_p7, %p4149_p4 }
 0x22a   : > { %4159 = shalt.err (!%p4156_p10)
}
 0x22b   : > { %3513 = dma.hbm_to_vmem [thread:$0]  (!%p5534_p5), %s5540_s29, 2048, %s774_s25, [#allocation23], %s5530_s4, %s5530_s4, %s5529_s11  }
 0x22c   : > { %s4468_s19 = smov [#allocation27]   ;;  %s4469_s2 = smov [#allocation30]  }
 0x22d   : > { %s797_s17 = sshll.u32 %s4468_s19, 4  ;;  %s824_s8 = sshll.u32 %s4469_s2, 4  ;;  %s798_s17 = int_to_ptr.vmem [resolvable:$true] %s797_s17  ;;  %s825_s8 = int_to_ptr.vmem [resolvable:$true] %s824_s8 }
 0x22e   : > { %s5541_s13 = sld [smem:[#allocation74_spill]] }
 0x234   : > { %s4160_s28 = scalar_lea.hbm %s5541_s13, 256 }
 0x235   : > { %p4161_p3 = scmp.ne.s32.totalorder %s5541_s13, %s4160_s28  ;;  %p4167_p1 = scmp.lt.u32.totalorder %s4160_s28, %s5541_s13 }
 0x237   : > { %p4163_p11 = pnand %p4161_p3, %p5533_p12 }
 0x239   : > { %p4164_p0 = pneg %p4163_p11 }
 0x23b   : > { %p4169_p6 = pnand %p4167_p1, %p4164_p0 }
 0x23d   : > { %4172 = shalt.err (!%p4169_p6)
}
 0x23e   : > { %s4173_s11 = scalar_lea.vmem %s798_s17, 256  ;;  %p4181_p9 = scmp.lt.s32.totalorder %s798_s17, %s798_s17 }
 0x23f   : > { %p4174_p8 = scmp.ne.s32.totalorder %s798_s17, %s4173_s11  ;;  %p4182_p2 = scmp.lt.s32.totalorder %s4173_s11, %s4173_s11 }
 0x241   : > { %p4176_p13 = pnand %p4174_p8, %p5533_p12  ;;  %p4183_p7 = por %p4182_p2, %p4181_p9 }
 0x243   : > { %p4177_p4 = pneg %p4176_p13 }
 0x245   : > { %p4184_p10 = pnand %p4183_p7, %p4177_p4 }
 0x247   : > { %4187 = shalt.err (!%p4184_p10)
}
 0x248   : > { %s5542_s10 = smov 4   ;;  %s5543_s4 = smov 64  }
 0x249   : > { %3519 = dma.hbm_to_vmem [thread:$0]  (!%p5534_p5), %s5541_s13, 256, %s798_s17, [#allocation26], %s5543_s4, %s5543_s4, %s5542_s10  }
 0x24a   : > { %s5544_s2 = sld [smem:[#allocation76_spill]] }
 0x250   : > { %s4188_s0 = scalar_lea.hbm %s5544_s2, 16 }
 0x251   : > { %p4189_p3 = scmp.ne.s32.totalorder %s5544_s2, %s4188_s0  ;;  %p4195_p1 = scmp.lt.u32.totalorder %s4188_s0, %s5544_s2 }
 0x253   : > { %p4191_p11 = pnand %p4189_p3, %p5533_p12 }
 0x255   : > { %p4192_p0 = pneg %p4191_p11 }
 0x257   : > { %p4197_p6 = pnand %p4195_p1, %p4192_p0 }
 0x259   : > { %4200 = shalt.err (!%p4197_p6)
}
 0x25a   : > { %s4201_s11 = scalar_lea.vmem %s825_s8, 16  ;;  %s4208_s17 = scalar_lea.vmem %s825_s8, 32 }
 0x25b   : > { %p4202_p8 = scmp.ne.s32.totalorder %s825_s8, %s4201_s11  ;;  %p4209_p9 = scmp.lt.s32.totalorder %s825_s8, %s825_s8 }
 0x25c   : > { %p4210_p2 = scmp.lt.s32.totalorder %s4208_s17, %s4201_s11 }
 0x25d   : > { %p4204_p13 = pnand %p4202_p8, %p5533_p12 }
 0x25e   : > { %p4211_p7 = por %p4210_p2, %p4209_p9 }
 0x25f   : > { %p4205_p4 = pneg %p4204_p13 }
 0x261   : > { %p4212_p10 = pnand %p4211_p7, %p4205_p4 }
 0x263   : > { %4215 = shalt.err (!%p4212_p10)
}
 0x264   : > { %3525 = dma.hbm_to_vmem [thread:$0]  (!%p5534_p5), %s5544_s2, 16, %s825_s8, [#allocation29]  }
 0x265   : > { %s5545_s7 = sld [smem:[#allocation78_spill]]  ;;  %s859_s19 = scalar_lea.vmem [#allocation33], %s4849_s16 }
 0x266   : > { %s866_s0 = sshll.u32 %s859_s19, 4  ;;  %p5546_p3 = scmp.ne.s32.totalorder %s5528_s9, 0  ;;  %s867_s0 = int_to_ptr.vmem [resolvable:$true] %s866_s0 }
 0x26b   : > { %s5164_s15 = scalar_lea.hbm %s5545_s7, %s4907_s12  ;;  %s4221_s8 = scalar_lea.hbm %s5545_s7, 32 }
 0x26c   : > { %s4216_s3 = scalar_lea.hbm %s5164_s15, 16  ;;  %p4222_p5 = scmp.lt.u32.totalorder %s5164_s15, %s5545_s7 }
 0x26d   : > { %p4217_p12 = scmp.ne.s32.totalorder %s5164_s15, %s4216_s3  ;;  %p4223_p1 = scmp.lt.u32.totalorder %s4221_s8, %s4216_s3 }
 0x26e   : > { %p4225_p8 = scmp.lt.u32.totalorder %s4216_s3, %s5164_s15 }
 0x26f   : > { %p4219_p11 = pnand %p4217_p12, %p5546_p3  ;;  %p4224_p6 = por %p4223_p1, %p4222_p5 }
 0x271   : > { %p4220_p0 = pneg %p4219_p11  ;;  %p4226_p13 = por %p4225_p8, %p4224_p6 }
 0x273   : > { %p4227_p4 = pnand %p4226_p13, %p4220_p0 }
 0x275   : > { %4230 = shalt.err (!%p4227_p4)
}
 0x276   : > { %s4231_s11 = scalar_lea.vmem %s867_s0, 16  ;;  %s4470_s17 = smov [#allocation33]  }
 0x277   : > { %p4232_p9 = scmp.ne.s32.totalorder %s867_s0, %s4231_s11  ;;  %s4236_s10 = sshll.u32 %s4470_s17, 4  ;;  %s4237_s10 = int_to_ptr.vmem [resolvable:$false] %s4236_s10 }
 0x278   : > { %s4238_s4 = scalar_lea.vmem %s4237_s10, 32  ;;  %p4239_p10 = scmp.lt.s32.totalorder %s867_s0, %s4237_s10 }
 0x279   : > { %p4234_p2 = pnand %p4232_p9, %p5546_p3  ;;  %p4240_p12 = scmp.lt.s32.totalorder %s4238_s4, %s4231_s11 }
 0x27b   : > { %p4235_p7 = pneg %p4234_p2  ;;  %p4241_p11 = por %p4240_p12, %p4239_p10 }
 0x27d   : > { %p4242_p1 = pnand %p4241_p11, %p4235_p7 }
 0x27f   : > { %4245 = shalt.err (!%p4242_p1)
}
 0x280   : > { %p5547_p5 = scmp.ne.s32.totalorder %s5526_s20, 0  ;;  %s5548_s14 = scalar_lea.sflag [#allocation32], %s4846_s18 }
 0x281   : > { %s5549_s3 = sld [smem:[#allocation80_spill]]  ;;  %s897_s28 = scalar_lea.vmem [#allocation36], %s4849_s16 }
 0x282   : > { %3532 = dma.hbm_to_vmem [thread:$0]  (!%p5547_p5), %s5164_s15, 16, %s867_s0, %s5548_s14  }
 0x283   : > { %s904_s8 = sshll.u32 %s897_s28, 4  ;;  %s905_s8 = int_to_ptr.vmem [resolvable:$true] %s904_s8 }
 0x287   : > { %s5190_s23 = scalar_lea.hbm %s5549_s3, %s4907_s12  ;;  %s4251_s15 = scalar_lea.hbm %s5549_s3, 32 }
 0x288   : > { %s4246_s27 = scalar_lea.hbm %s5190_s23, 16  ;;  %p4252_p13 = scmp.lt.u32.totalorder %s5190_s23, %s5549_s3 }
 0x289   : > { %p4247_p0 = scmp.ne.s32.totalorder %s5190_s23, %s4246_s27  ;;  %p4253_p4 = scmp.lt.u32.totalorder %s4251_s15, %s4246_s27 }
 0x28a   : > { %p4255_p2 = scmp.lt.u32.totalorder %s4246_s27, %s5190_s23 }
 0x28b   : > { %p4249_p6 = pnand %p4247_p0, %p5546_p3  ;;  %p4254_p9 = por %p4253_p4, %p4252_p13 }
 0x28d   : > { %p4250_p8 = pneg %p4249_p6  ;;  %p4256_p7 = por %p4255_p2, %p4254_p9 }
 0x28f   : > { %p4257_p10 = pnand %p4256_p7, %p4250_p8 }
 0x291   : > { %4260 = shalt.err (!%p4257_p10)
}
 0x292   : > { %s4261_s10 = scalar_lea.vmem %s905_s8, 16  ;;  %s4471_s4 = smov [#allocation36]  }
 0x293   : > { %p4262_p12 = scmp.ne.s32.totalorder %s905_s8, %s4261_s10  ;;  %s4266_s14 = sshll.u32 %s4471_s4, 4  ;;  %s4267_s14 = int_to_ptr.vmem [resolvable:$false] %s4266_s14 }
 0x294   : > { %s4268_s25 = scalar_lea.vmem %s4267_s14, 32  ;;  %p4269_p0 = scmp.lt.s32.totalorder %s905_s8, %s4267_s14 }
 0x295   : > { %p4264_p11 = pnand %p4262_p12, %p5546_p3  ;;  %p4270_p6 = scmp.lt.s32.totalorder %s4268_s25, %s4261_s10 }
 0x297   : > { %p4265_p1 = pneg %p4264_p11  ;;  %p4271_p5 = por %p4270_p6, %p4269_p0 }
 0x299   : > { %p4272_p4 = pnand %p4271_p5, %p4265_p1 }
 0x29b   : > { %4275 = shalt.err (!%p4272_p4)
}
 0x29c   : > { %p5550_p13 = scmp.ne.s32.totalorder %s5526_s20, 0  ;;  %s5551_s19 = scalar_lea.sflag [#allocation35], %s4846_s18 }
 0x29d   : > { %s5552_s5 = sld [smem:[#allocation81_spill]]  ;;  %s931_s0 = scalar_lea.vmem [#allocation39], %s4849_s16 }
 0x29e   : > { %3538 = dma.hbm_to_vmem [thread:$0]  (!%p5550_p13), %s5190_s23, 16, %s905_s8, %s5551_s19  }
 0x29f   : > { %s938_s17 = sshll.u32 %s931_s0, 4  ;;  %s939_s17 = int_to_ptr.vmem [resolvable:$true] %s938_s17 }
 0x2a3   : > { %s5553_s11 = smov %s5552_s5  ;;  %s5216_s15 = scalar_lea.hbm %s5552_s5, %s4907_s12 }
 0x2a4   : > { %s4276_s10 = scalar_lea.hbm %s5216_s15, 16  ;;  %s4281_s23 = scalar_lea.hbm %s5553_s11, 32 }
 0x2a5   : > { %p4277_p5 = scmp.ne.s32.totalorder %s5216_s15, %s4276_s10  ;;  %p4282_p2 = scmp.lt.u32.totalorder %s5216_s15, %s5553_s11 }
 0x2a6   : > { %p4283_p7 = scmp.lt.u32.totalorder %s4281_s23, %s4276_s10  ;;  %p4285_p12 = scmp.lt.u32.totalorder %s4276_s10, %s5216_s15 }
 0x2a7   : > { %p4279_p8 = pnand %p4277_p5, %p5546_p3 }
 0x2a8   : > { %p4284_p10 = por %p4283_p7, %p4282_p2 }
 0x2a9   : > { %p4280_p9 = pneg %p4279_p8 }
 0x2aa   : > { %p4286_p11 = por %p4285_p12, %p4284_p10 }
 0x2ac   : > { %p4287_p1 = pnand %p4286_p11, %p4280_p9 }
 0x2ae   : > { %4290 = shalt.err (!%p4287_p1)
}
 0x2af   : > { %s4291_s16 = scalar_lea.vmem %s939_s17, 16  ;;  %s4472_s12 = smov [#allocation39]  }
 0x2b0   : > { %p4292_p0 = scmp.ne.s32.totalorder %s939_s17, %s4291_s16  ;;  %s4296_s19 = sshll.u32 %s4472_s12, 4  ;;  %s4297_s19 = int_to_ptr.vmem [resolvable:$false] %s4296_s19 }
 0x2b1   : > { %s4298_s28 = scalar_lea.vmem %s4297_s19, 32  ;;  %p4299_p5 = scmp.lt.s32.totalorder %s939_s17, %s4297_s19 }
 0x2b2   : > { %p4294_p6 = pnand %p4292_p0, %p5546_p3  ;;  %p4300_p8 = scmp.lt.s32.totalorder %s4298_s28, %s4291_s16 }
 0x2b4   : > { %p4295_p4 = pneg %p4294_p6  ;;  %p4301_p13 = por %p4300_p8, %p4299_p5 }
 0x2b6   : > { %p4302_p2 = pnand %p4301_p13, %p4295_p4 }
 0x2b8   : > { %4305 = shalt.err (!%p4302_p2)
}
 0x2b9   : > { %p5554_p7 = scmp.ne.s32.totalorder %s5526_s20, 0  ;;  %s5555_s27 = scalar_lea.sflag [#allocation38], %s4846_s18 }
 0x2ba   : > { %s5556_s5 = sld [smem:[#allocation58_spill]] }
 0x2bb   : > { %3544 = dma.hbm_to_vmem [thread:$0]  (!%p5554_p7), %s5216_s15, 16, %s939_s17, %s5555_s27  }
 0x2c0   : > { %p5557_p9 = scmp.ne.s32.totalorder %s5556_s5, 0 }
 0x2c1   : > { %p5558_p3 = scmp.eq.s32.totalorder (!%p5557_p9), %s4627_s6, 0 }
 0x2c2   : > { %947 = sbr.rel (%p5557_p9) target bundleno = 3035 (0xbdb), region = 112 }
 0x2c9   : > { %4375 = dma.done.wait (%p5558_p3), [#allocation5], 256   ;;  %p5559_p10 = pmov %p5558_p3 }
 0x2ca   : > { %p5560_p12 = pmov %p5558_p3 }
 0x2cb   : > { %4377 = vsyncadd (%p5559_p10), [#allocation5], 4294967040 }
 0x2cc   : > { %4379 = dma.done.wait (%p5560_p12), [#allocation8], 2560   ;;  %p5561_p13 = pmov %p5558_p3 }
 0x2cd   : > { %p5562_p11 = pmov %p5558_p3 }
 0x2ce   : > { %4381 = vsyncadd (%p5561_p13), [#allocation8], 4294964736 }
 0x2cf   : > { %4383 = dma.done.wait (%p5562_p11), [#allocation11], 2064   ;;  %p5563_p1 = pmov %p5558_p3 }
 0x2d1   : > { %4385 = vsyncadd (%p5563_p1), [#allocation11], 4294965232  ;;  %p5564_p0 = pmov %p5563_p1 }
 0x2d3   : > { %4387 = dma.done.wait (%p5564_p0), [#allocation14], 2064   ;;  %p5565_p6 = pmov %p5564_p0 }
 0x2d4   : > { %p5566_p4 = pmov %p5564_p0 }
 0x2d5   : > { %4389 = vsyncadd (%p5565_p6), [#allocation14], 4294965232 }
 0x2d6   : > { %4391 = dma.done.wait (%p5566_p4), [#allocation17], 2064   ;;  %p5567_p5 = pmov %p5564_p0 }
 0x2d7   : > { %p5568_p8 = pmov %p5564_p0 }
 0x2d8   : > { %4393 = vsyncadd (%p5567_p5), [#allocation17], 4294965232 }
 0x2d9   : > { %4395 = dma.done.wait (%p5568_p8), [#allocation20], 2064   ;;  %p5569_p2 = pmov %p5564_p0 }
 0x2da   : > { %p5570_p7 = pmov %p5564_p0 }
 0x2db   : > { %4397 = vsyncadd (%p5569_p2), [#allocation20], 4294965232 }
 0x2dc   : > { %4399 = dma.done.wait (%p5570_p7), [#allocation23], 2064   ;;  %p5571_p9 = pmov %p5564_p0 }
 0x2dd   : > { %p5572_p3 = pmov %p5564_p0 }
 0x2de   : > { %4401 = vsyncadd (%p5571_p9), [#allocation23], 4294965232 }
 0x2df   : > { %4403 = dma.done.wait (%p5572_p3), [#allocation26], 272   ;;  %p5573_p10 = pmov %p5564_p0 }
 0x2e0   : > { %p5574_p12 = pmov %p5564_p0 }
 0x2e1   : > { %4405 = vsyncadd (%p5573_p10), [#allocation26], 4294967024 }
 0x2e2   : > { %4407 = dma.done.wait (%p5574_p12), [#allocation29], 144   ;;  %p5575_p13 = pmov %p5564_p0 }
 0x2e3   : > { %s1017_s9 = sand.u32 1, %s4627_s6   ;;  %s5278_s20 = sand.u32 1, %s4436_s26  }
 0x2e4   : > { %4409 = vsyncadd (%p5575_p13), [#allocation29], 4294967152  ;;  %s2621_s18 = sshll.u32 %s5278_s20, 7  ;;  %s1018_s15 = scalar_lea.sflag [#allocation32], %s1017_s9 }
 0x2e5   : > { %s5281_s0 = scalar_lea.vmem [#allocation31], %s2621_s18  ;;  %p5576_p11 = scmp.ne.s32.totalorder %s5524_s1, 0 }
 0x2e7   : > { %4411 = dma.done.wait (%p5576_p11), %s1018_s15, 2064  }
 0x2e8   : > { %4413 = vsyncadd (%p5576_p11), %s1018_s15, 4294965232  ;;  %s1029_s17 = scalar_lea.vmem [#allocation33], %s5278_s20  ;;  %s1035_s10 = scalar_lea.sflag [#allocation35], %s1017_s9 }
 0x2e9   : > { %s5288_s4 = scalar_lea.vmem [#allocation34], %s2621_s18 }
 0x2ea   : > { %4415 = dma.done.wait (%p5576_p11), %s1035_s10, 2064  }
 0x2eb   : > { %4417 = vsyncadd (%p5576_p11), %s1035_s10, 4294965232  ;;  %s1046_s14 = scalar_lea.vmem [#allocation36], %s5278_s20  ;;  %s1052_s23 = scalar_lea.sflag [#allocation38], %s1017_s9 }
 0x2ec   : > { %s1054_s8 = scalar_lea.vmem [#allocation37], %s5278_s20 }
 0x2ed   : > { %4419 = dma.done.wait (%p5576_p11), %s1052_s23, 32  }
 0x2ee   : > { %4421 = vsyncadd (%p5576_p11), %s1052_s23, 4294967264  ;;  %s1062_s25 = scalar_lea.vmem [#allocation39], %s5278_s20  ;;  %p5577_p1 = scmp.ne.s32.totalorder %s4627_s6, 0 }
 0x2ef   : > { %v1166_v0 = vld [vmem:[#allocation9] sm:$0xff] (!%p5577_p1)  ;;  %v1167_v1 = vld [vmem:[#allocation9 + $0x8] sm:$0xff] (!%p5577_p1)  ;;  %v1168_v2 = vld [vmem:[#allocation9 + $0x10] sm:$0xff] (!%p5577_p1) }
 0x2f0   : > { %1147 = sbr.rel (%p5577_p1) target bundleno = 1694 (0x69e), region = 208  ;;  %v3118_v3 = vpack.c.bf16 (!%p5577_p1), %v1167_v1, %v1166_v0  ;;  %v1169_v4 = vld [vmem:[#allocation9 + $0x18] sm:$0xff] (!%p5577_p1)  ;;  %v1170_v6 = vld [vmem:[#allocation9 + $0x20] sm:$0xff] (!%p5577_p1)  ;;  %v1171_v7 = vld [vmem:[#allocation9 + $0x28] sm:$0xff] (!%p5577_p1) }
 0x2f1   : > { %v3122_v5 = vpack.c.bf16 (!%p5577_p1), %v1169_v4, %v1168_v2  ;;  %v3126_v8 = vpack.c.bf16 (!%p5577_p1), %v1171_v7, %v1170_v6  ;;  %v1172_v9 = vld [vmem:[#allocation9 + $0x30] sm:$0xff] (!%p5577_p1)  ;;  %v1173_v10 = vld [vmem:[#allocation9 + $0x38] sm:$0xff] (!%p5577_p1)  ;;  %v1266_v13 = vld [vmem:[#allocation12] sm:$0xff] (!%p5577_p1) }
 0x2f2   : > { %3119 = vmatprep.subr.bf16.mxu0 (!%p5577_p1), %v3118_v3  ;;  %v1148_v11 = vld [vmem:[#allocation4] sm:$0xff] (!%p5577_p1)  ;;  %v1269_v17 = vld [vmem:[#allocation12 + $0x18] sm:$0xff] (!%p5577_p1)  ;;  %v1270_v20 = vld [vmem:[#allocation12 + $0x20] sm:$0xff] (!%p5577_p1)  ;;  %v3130_v22 = vpack.c.bf16 (!%p5577_p1), %v1173_v10, %v1172_v9 }
 0x2f3   : > { %3121 = vmatpush3.bf16.msra.mxu0 (!%p5577_p1), %v3118_v3  ;;  %v3374_v12 = vtrunc.f32 (!%p5577_p1), %v1148_v11  ;;  %v1267_v14 = vld [vmem:[#allocation12 + $0x8] sm:$0xff] (!%p5577_p1)  ;;  %v1268_v15 = vld [vmem:[#allocation12 + $0x10] sm:$0xff] (!%p5577_p1)  ;;  %v1174_v23 = vld [vmem:[#allocation9 + $0x40] sm:$0xff] (!%p5577_p1) }
 0x2f4   : > { %3123 = vmatprep.subr.bf16.mxu0 (!%p5577_p1), %v3122_v5  ;;  %v3150_v16 = vpack.c.bf16 (!%p5577_p1), %v1267_v14, %v1266_v13  ;;  %v3154_v19 = vpack.c.bf16 (!%p5577_p1), %v1269_v17, %v1268_v15  ;;  %v1271_v21 = vld [vmem:[#allocation12 + $0x28] sm:$0xff] (!%p5577_p1)  ;;  %v1272_v27 = vld [vmem:[#allocation12 + $0x30] sm:$0xff] (!%p5577_p1)  ;;  %v1273_v28 = vld [vmem:[#allocation12 + $0x38] sm:$0xff] (!%p5577_p1) }
 0x2f5   : > { %v3375_v18 = vcvt.f32.s32 (!%p5577_p1), %v3374_v12  ;;  %v1175_v24 = vld [vmem:[#allocation9 + $0x48] sm:$0xff] (!%p5577_p1)  ;;  %v3158_v26 = vpack.c.bf16 (!%p5577_p1), %v1271_v21, %v1270_v20  ;;  %v1176_v30 = vld [vmem:[#allocation9 + $0x50] sm:$0xff] (!%p5577_p1)  ;;  %v1177_v31 = vld [vmem:[#allocation9 + $0x58] sm:$0xff] (!%p5577_p1)  ;;  %v3162_v32 = vpack.c.bf16 (!%p5577_p1), %v1273_v28, %v1272_v27 }
 0x2f6   : > { %3151 = vmatprep.subr.bf16.mxu1 (!%p5577_p1), %v3150_v16  ;;  %v3134_v29 = vpack.c.bf16 (!%p5577_p1), %v1175_v24, %v1174_v23  ;;  %v1274_v33 = vld [vmem:[#allocation12 + $0x40] sm:$0xff] (!%p5577_p1)  ;;  %v1275_v34 = vld [vmem:[#allocation12 + $0x48] sm:$0xff] (!%p5577_p1)  ;;  %v3138_v35 = vpack.c.bf16 (!%p5577_p1), %v1177_v31, %v1176_v30  ;;  %v1149_v39 = vld [vmem:[#allocation4 + $0x8] sm:$0xff] (!%p5577_p1) }
 0x2f7   : > { %3125 = vmatpush3.bf16.msra.mxu0 %v3122_v5  ;;  %v1152_v25 = vcvt.s32.f32 %v3375_v18  ;;  %3153 = vmatpush3.bf16.msra.mxu1 %v3150_v16  ;;  %v1178_v36 = vld [vmem:[#allocation9 + $0x60] sm:$0xff]  ;;  %v1179_v37 = vld [vmem:[#allocation9 + $0x68] sm:$0xff]  ;;  %v3166_v38 = vpack.c.bf16 %v1275_v34, %v1274_v33  ;;  %v1276_v40 = vld [vmem:[#allocation12 + $0x50] sm:$0xff]  ;;  %v3376_v45 = vtrunc.f32 %v1149_v39 }
 0x2f8   : > { %3127 = vmatprep.subr.bf16.mxu0 %v3126_v8  ;;  %3155 = vmatprep.subr.bf16.mxu1 %v3154_v19  ;;  %v1277_v41 = vld [vmem:[#allocation12 + $0x58] sm:$0xff]  ;;  %v3142_v42 = vpack.c.bf16 %v1179_v37, %v1178_v36  ;;  %v1180_v43 = vld [vmem:[#allocation9 + $0x70] sm:$0xff]  ;;  %v1278_v47 = vld [vmem:[#allocation12 + $0x60] sm:$0xff] }
 0x2f9   : > { %2841 = vmatprep.mubr.f32.mxu0 %v1152_v25  ;;  %v1181_v44 = vld [vmem:[#allocation9 + $0x78] sm:$0xff]  ;;  %v3170_v46 = vpack.c.bf16 %v1277_v41, %v1276_v40  ;;  %v1279_v48 = vld [vmem:[#allocation12 + $0x68] sm:$0xff]  ;;  %v3377_v50 = vcvt.f32.s32 %v3376_v45  ;;  %v1154_v16 = vld [vmem:[#allocation7] sm:$0xff] }
 0x2fa   : > { %v3146_v49 = vpack.c.bf16 %v1181_v44, %v1180_v43  ;;  %v3174_v51 = vpack.c.bf16 %v1279_v48, %v1278_v47  ;;  %v1280_v53 = vld [vmem:[#allocation12 + $0x70] sm:$0xff]  ;;  %v1281_v54 = vld [vmem:[#allocation12 + $0x78] sm:$0xff]  ;;  %v1468_v56 = vld [vmem:[#allocation18] sm:$0xff]  ;;  %v3378_v17 = vtrunc.f32 %v1154_v16 }
 0x2fb   : > { %3129 = vmatpush3.bf16.msra.mxu0 %v3126_v8  ;;  %3157 = vmatpush3.bf16.msra.mxu1 %v3154_v19  ;;  %v1153_v52 = vcvt.s32.f32 %v3377_v50  ;;  %v3178_v55 = vpack.c.bf16 %v1281_v54, %v1280_v53  ;;  %v1469_v57 = vld [vmem:[#allocation18 + $0x8] sm:$0xff]  ;;  %v1366_v59 = vld [vmem:[#allocation15] sm:$0xff]  ;;  %v1369_v63 = vld [vmem:[#allocation15 + $0x18] sm:$0xff] }
 0x2fc   : > { %3131 = vmatprep.subr.bf16.mxu0 %v3130_v22  ;;  %3159 = vmatprep.subr.bf16.mxu1 %v3158_v26  ;;  %v3214_v58 = vpack.c.bf16 %v1469_v57, %v1468_v56  ;;  %v1367_v60 = vld [vmem:[#allocation15 + $0x8] sm:$0xff]  ;;  %v1368_v61 = vld [vmem:[#allocation15 + $0x10] sm:$0xff]  ;;  %v1370_v1 = vld [vmem:[#allocation15 + $0x20] sm:$0xff]  ;;  %v3379_v20 = vcvt.f32.s32 %v3378_v17 }
 0x2fd   : > { %v3182_v62 = vpack.c.bf16 %v1367_v60, %v1366_v59  ;;  %v3186_v0 = vpack.c.bf16 %v1369_v63, %v1368_v61  ;;  %v1371_v2 = vld [vmem:[#allocation15 + $0x28] sm:$0xff]  ;;  %v1372_v4 = vld [vmem:[#allocation15 + $0x30] sm:$0xff]  ;;  %v1373_v5 = vld [vmem:[#allocation15 + $0x38] sm:$0xff] }
 0x2fe   : > { %v3190_v3 = vpack.c.bf16 %v1371_v2, %v1370_v1  ;;  %v3194_v6 = vpack.c.bf16 %v1373_v5, %v1372_v4  ;;  %v1374_v7 = vld [vmem:[#allocation15 + $0x40] sm:$0xff]  ;;  %v1375_v8 = vld [vmem:[#allocation15 + $0x48] sm:$0xff]  ;;  %v1376_v10 = vld [vmem:[#allocation15 + $0x50] sm:$0xff]  ;;  %v1162_v27 = vcvt.s32.f32 %v3379_v20 }
 0x2ff   : > { %3133 = vmatpush3.bf16.msra.mxu0 %v3130_v22  ;;  %3161 = vmatpush3.bf16.msra.mxu1 %v3158_v26  ;;  %v3198_v9 = vpack.c.bf16 %v1375_v8, %v1374_v7  ;;  %v1377_v11 = vld [vmem:[#allocation15 + $0x58] sm:$0xff]  ;;  %v1378_v13 = vld [vmem:[#allocation15 + $0x60] sm:$0xff]  ;;  %v1379_v14 = vld [vmem:[#allocation15 + $0x68] sm:$0xff] }
 0x300   : > { %3135 = vmatprep.subr.bf16.mxu0 %v3134_v29  ;;  %3163 = vmatprep.subr.bf16.mxu1 %v3162_v32  ;;  %v3202_v12 = vpack.c.bf16 %v1377_v11, %v1376_v10  ;;  %v3206_v15 = vpack.c.bf16 %v1379_v14, %v1378_v13  ;;  %v2624_v18 = vld [vmem:[#allocation10] ss:$0 sm:$0xff]  ;;  %v1470_v24 = vld [vmem:[#allocation18 + $0x10] sm:$0xff]  ;;  %v1472_v30 = vld [vmem:[#allocation18 + $0x20] sm:$0xff] }
 0x301   : > { %v1471_v25 = vld [vmem:[#allocation18 + $0x18] sm:$0xff]  ;;  %v1473_v31 = vld [vmem:[#allocation18 + $0x28] sm:$0xff]  ;;  %v1474_v33 = vld [vmem:[#allocation18 + $0x30] sm:$0xff] }
 0x302   : > { %v1475_v34 = vld [vmem:[#allocation18 + $0x38] sm:$0xff]  ;;  %v1476_v36 = vld [vmem:[#allocation18 + $0x40] sm:$0xff]  ;;  %v1477_v37 = vld [vmem:[#allocation18 + $0x48] sm:$0xff] }
 0x303   : > { %3137 = vmatpush3.bf16.msra.mxu0 %v3134_v29  ;;  %3165 = vmatpush3.bf16.msra.mxu1 %v3162_v32  ;;  %v3218_v29 = vpack.c.bf16 %v1471_v25, %v1470_v24  ;;  %v3222_v32 = vpack.c.bf16 %v1473_v31, %v1472_v30  ;;  %v1478_v39 = vld [vmem:[#allocation18 + $0x50] sm:$0xff]  ;;  %v1479_v40 = vld [vmem:[#allocation18 + $0x58] sm:$0xff]  ;;  %v1481_v43 = vld [vmem:[#allocation18 + $0x68] sm:$0xff] }
 0x304   : > { %3139 = vmatprep.subr.bf16.mxu0 %v3138_v35  ;;  %3167 = vmatprep.subr.bf16.mxu1 %v3166_v38  ;;  %v3234_v41 = vpack.c.bf16 %v1479_v40, %v1478_v39  ;;  %v1155_v44 = vld [vmem:[#allocation7 + $0x8] sm:$0xff]  ;;  %v1482_v47 = vld [vmem:[#allocation18 + $0x70] sm:$0xff]  ;;  %v1483_v48 = vld [vmem:[#allocation18 + $0x78] sm:$0xff] }
 0x305   : > { %v1380_v60 = vld [vmem:[#allocation15 + $0x70] sm:$0xff]  ;;  %v1381_v61 = vld [vmem:[#allocation15 + $0x78] sm:$0xff]  ;;  %v1580_v63 = vld [vmem:[#allocation21] sm:$0xff] }
 0x306   : > { %v2625_v2 = vld [vmem:[#allocation13] ss:$0 sm:$0xff]  ;;  %v1582_v7 = vld [vmem:[#allocation21 + $0x10] sm:$0xff]  ;;  %v1585_v13 = vld [vmem:[#allocation21 + $0x28] sm:$0xff] }
 0x307   : > { %3141 = vmatpush3.bf16.msra.mxu0 %v3138_v35  ;;  %3169 = vmatpush3.bf16.msra.mxu1 %v3166_v38  ;;  %v3226_v35 = vpack.c.bf16 %v1475_v34, %v1474_v33  ;;  %v3230_v38 = vpack.c.bf16 %v1477_v37, %v1476_v36  ;;  %v1583_v8 = vld [vmem:[#allocation21 + $0x18] sm:$0xff]  ;;  %v1592_v24 = vld [vmem:[#allocation21 + $0x60] sm:$0xff]  ;;  %v1593_v25 = vld [vmem:[#allocation21 + $0x68] sm:$0xff] }
 0x308   : > { %3143 = vmatprep.subr.bf16.mxu0 %v3142_v42  ;;  %3171 = vmatprep.subr.bf16.mxu1 %v3170_v46  ;;  %v3250_v11 = vpack.c.bf16 %v1583_v8, %v1582_v7  ;;  %v1587_v16 = vld [vmem:[#allocation21 + $0x38] sm:$0xff] }
 0x309   : > { %v2627_v30 = vld [vmem:[#allocation19] ss:$0 sm:$0xff] }
 0x30b   : > { %3145 = vmatpush3.bf16.msra.mxu0 %v3142_v42  ;;  %3173 = vmatpush3.bf16.msra.mxu1 %v3170_v46  ;;  %v1480_v42 = vld [vmem:[#allocation18 + $0x60] sm:$0xff]  ;;  %v1156_v46 = vld [vmem:[#allocation7 + $0x10] sm:$0xff] }
 0x30c   : > { %3147 = vmatprep.subr.bf16.mxu0 %v3146_v49  ;;  %3175 = vmatprep.subr.bf16.mxu1 %v3174_v51  ;;  %v3238_v45 = vpack.c.bf16 %v1481_v43, %v1480_v42  ;;  %v3382_v50 = vtrunc.f32 %v1156_v46  ;;  %v1692_v43 = vld [vmem:[#allocation24] sm:$0xff]  ;;  %v1694_v46 = vld [vmem:[#allocation24 + $0x10] sm:$0xff] }
 0x30f   : > { %3149 = vmatpush3.bf16.msra.mxu0 %v3146_v49  ;;  %3177 = vmatpush3.bf16.msra.mxu1 %v3174_v51  ;;  %v3380_v49 = vtrunc.f32 %v1155_v44  ;;  %v1157_v51 = vld [vmem:[#allocation7 + $0x18] sm:$0xff] }
 0x310   : > { %3179 = vmatprep.subr.bf16.mxu1 %v3178_v55  ;;  %3183 = vmatprep.subr.bf16.mxu0 %v3182_v62  ;;  %v3384_v54 = vtrunc.f32 %v1157_v51  ;;  %v1693_v44 = vld [vmem:[#allocation24 + $0x8] sm:$0xff] }
 0x311   : > { %v3381_v53 = vcvt.f32.s32 %v3380_v49 }
 0x312   : > { %2842 = vmatmul.mubr.f32.vlgmr.msra.gmra.mrb[0].mxu0 %v1153_v52  ;;  %v3242_v52 = vpack.c.bf16 %v1483_v48, %v1482_v47  ;;  %v3385_v57 = vcvt.f32.s32 %v3384_v54  ;;  %v1695_v47 = vld [vmem:[#allocation24 + $0x18] sm:$0xff]  ;;  %v1696_v48 = vld [vmem:[#allocation24 + $0x20] sm:$0xff] }
 0x313   : > { %3181 = vmatpush3.bf16.msra.mxu1 %v3178_v55  ;;  %3185 = vmatpush3.bf16.msra.mxu0 %v3182_v62  ;;  %v3383_v55 = vcvt.f32.s32 %v3382_v50  ;;  %v1163_v56 = vcvt.s32.f32 %v3381_v53  ;;  %v3210_v62 = vpack.c.bf16 %v1381_v61, %v1380_v60  ;;  %v3282_v49 = vpack.c.bf16 %v1695_v47, %v1694_v46  ;;  %v1697_v50 = vld [vmem:[#allocation24 + $0x28] sm:$0xff]  ;;  %v1699_v53 = vld [vmem:[#allocation24 + $0x38] sm:$0xff]  ;;  %v1704_v61 = vld [vmem:[#allocation24 + $0x60] sm:$0xff] }
 0x314   : > { %3215 = vmatprep.subr.bf16.mxu1 %v3214_v58  ;;  %3187 = vmatprep.subr.bf16.mxu0 %v3186_v0  ;;  %v1165_v59 = vcvt.s32.f32 %v3385_v57  ;;  %v3286_v51 = vpack.c.bf16 %v1697_v50, %v1696_v48 }
 0x317   : > { %3189 = vmatpush3.bf16.msra.mxu0 %v3186_v0  ;;  %v1581_v0 = vld [vmem:[#allocation21 + $0x8] sm:$0xff] }
 0x318   : > { %3191 = vmatprep.subr.bf16.mxu0 %v3190_v3  ;;  %v3246_v1 = vpack.c.bf16 %v1581_v0, %v1580_v63  ;;  %v1706_v0 = vld [vmem:[#allocation24 + $0x70] sm:$0xff] }
 0x31b   : > { %3193 = vmatpush3.bf16.msra.mxu0 %v3190_v3 }
 0x31c   : > { %3195 = vmatprep.subr.bf16.mxu0 %v3194_v6 }
 0x31f   : > { %3197 = vmatpush3.bf16.msra.mxu0 %v3194_v6 }
 0x320   : > { %3199 = vmatprep.subr.bf16.mxu0 %v3198_v9 }
 0x323   : > { %3201 = vmatpush3.bf16.msra.mxu0 %v3198_v9 }
 0x324   : > { %3203 = vmatprep.subr.bf16.mxu0 %v3202_v12 }
 0x327   : > { %3205 = vmatpush3.bf16.msra.mxu0 %v3202_v12  ;;  %v1584_v12 = vld [vmem:[#allocation21 + $0x20] sm:$0xff] }
 0x328   : > { %3207 = vmatprep.subr.bf16.mxu0 %v3206_v15  ;;  %v3254_v14 = vpack.c.bf16 %v1585_v13, %v1584_v12 }
 0x32b   : > { %3209 = vmatpush3.bf16.msra.mxu0 %v3206_v15  ;;  %v1586_v15 = vld [vmem:[#allocation21 + $0x30] sm:$0xff] }
 0x32c   : > { %3211 = vmatprep.subr.bf16.mxu0 %v3210_v62  ;;  %v3258_v17 = vpack.c.bf16 %v1587_v16, %v1586_v15 }
 0x32f   : > { %3213 = vmatpush3.bf16.msra.mxu0 %v3210_v62  ;;  %v1705_v62 = vld [vmem:[#allocation24 + $0x68] sm:$0xff] }
 0x330   : > { %3247 = vmatprep.subr.bf16.mxu0 %v3246_v1  ;;  %v3302_v63 = vpack.c.bf16 %v1705_v62, %v1704_v61 }
 0x3e5   : > { %v2843_v19 = vpop.f32.mrb[0].mxu0 }
 0x3e6   : > { %v1261_v21 = vadd.f32 %v2843_v19, %v2624_v18  ;;  %v1255_v22 = vpop.f32.mrb[1].mxu0  ;;  %v1589_v19 = vld [vmem:[#allocation21 + $0x48] sm:$0xff] }
 0x3e7   : > { %v1256_v23 = vadd.f32 %v2624_v18, %v1255_v22  ;;  %v1588_v18 = vld [vmem:[#allocation21 + $0x40] sm:$0xff]  ;;  %v1591_v22 = vld [vmem:[#allocation21 + $0x58] sm:$0xff] }
 0x3e8   : > { %v1265_v28 = vmax.f32 %v1261_v21, 0.0  ;;  %v3262_v20 = vpack.c.bf16 %v1589_v19, %v1588_v18  ;;  %v1590_v21 = vld [vmem:[#allocation21 + $0x50] sm:$0xff] }
 0x3e9   : > { %v1264_v26 = vmax.f32 %v1256_v23, 0.0  ;;  %v3266_v23 = vpack.c.bf16 %v1591_v22, %v1590_v21 }
 0x3eb   : > { %2876 = vmatprep.mubr.f32.mxu1 %v1264_v26  ;;  %v3270_v26 = vpack.c.bf16 %v1593_v25, %v1592_v24 }
 0x3ec   : > { %2877 = vmatmul.mubr.f32.vlgmr.msra.gmra.mrb[0].mxu1 %v1265_v28  ;;  %v1595_v28 = vld [vmem:[#allocation21 + $0x78] sm:$0xff] }
 0x3ed   : > { %3217 = vmatpush3.bf16.msra.mxu1 %v3214_v58  ;;  %2946 = vmatprep.mubr.f32.mxu1 %v1162_v27  ;;  %v1164_v58 = vcvt.s32.f32 %v3383_v55  ;;  %v1594_v27 = vld [vmem:[#allocation21 + $0x70] sm:$0xff]  ;;  %v1700_v55 = vld [vmem:[#allocation24 + $0x40] sm:$0xff] }
 0x3ee   : > { %3219 = vmatprep.subr.bf16.mxu1 %v3218_v29 }
 0x3f1   : > { %3221 = vmatpush3.bf16.msra.mxu1 %v3218_v29  ;;  %v3274_v29 = vpack.c.bf16 %v1595_v28, %v1594_v27 }
 0x3f2   : > { %3223 = vmatprep.subr.bf16.mxu1 %v3222_v32 }
 0x3f5   : > { %3225 = vmatpush3.bf16.msra.mxu1 %v3222_v32 }
 0x3f6   : > { %3227 = vmatprep.subr.bf16.mxu1 %v3226_v35 }
 0x3f9   : > { %3229 = vmatpush3.bf16.msra.mxu1 %v3226_v35 }
 0x3fa   : > { %3231 = vmatprep.subr.bf16.mxu1 %v3230_v38 }
 0x3fd   : > { %3233 = vmatpush3.bf16.msra.mxu1 %v3230_v38 }
 0x3fe   : > { %3235 = vmatprep.subr.bf16.mxu1 %v3234_v41 }
 0x401   : > { %3237 = vmatpush3.bf16.msra.mxu1 %v3234_v41 }
 0x402   : > { %3239 = vmatprep.subr.bf16.mxu1 %v3238_v45 }
 0x405   : > { %3241 = vmatpush3.bf16.msra.mxu1 %v3238_v45  ;;  %v3278_v45 = vpack.c.bf16 %v1693_v44, %v1692_v43 }
 0x406   : > { %3243 = vmatprep.subr.bf16.mxu1 %v3242_v52 }
 0x409   : > { %3245 = vmatpush3.bf16.msra.mxu1 %v3242_v52  ;;  %v1698_v52 = vld [vmem:[#allocation24 + $0x30] sm:$0xff] }
 0x40a   : > { %3279 = vmatprep.subr.bf16.mxu1 %v3278_v45  ;;  %v3290_v54 = vpack.c.bf16 %v1699_v53, %v1698_v52 }
 0x40c   : > { %2947 = vmatmul.mubr.f32.vlgmr.msra.gmra.mrb[2].mxu1 %v1163_v56  ;;  %v1701_v56 = vld [vmem:[#allocation24 + $0x48] sm:$0xff] }
 0x40d   : > { %2949 = vmatprep.mubr.f32.mxu1 %v1164_v58  ;;  %3281 = vmatpush3.bf16.msra.mxu1 %v3278_v45  ;;  %v3294_v57 = vpack.c.bf16 %v1701_v56, %v1700_v55  ;;  %v1702_v58 = vld [vmem:[#allocation24 + $0x50] sm:$0xff] }
 0x40e   : > { %3283 = vmatprep.subr.bf16.mxu1 %v3282_v49 }
 0x410   : > { %2950 = vmatmul.mubr.f32.gmra.mrb[4].mxu1 %v1165_v59  ;;  %v1703_v59 = vld [vmem:[#allocation24 + $0x58] sm:$0xff] }
 0x411   : > { %3285 = vmatpush3.bf16.msra.mxu1 %v3282_v49  ;;  %v3298_v60 = vpack.c.bf16 %v1703_v59, %v1702_v58 }
 0x412   : > { %3287 = vmatprep.subr.bf16.mxu1 %v3286_v51 }
 0x415   : > { %3289 = vmatpush3.bf16.msra.mxu1 %v3286_v51 }
 0x416   : > { %3291 = vmatprep.subr.bf16.mxu1 %v3290_v54 }
 0x419   : > { %3293 = vmatpush3.bf16.msra.mxu1 %v3290_v54 }
 0x41a   : > { %3295 = vmatprep.subr.bf16.mxu1 %v3294_v57 }
 0x41d   : > { %3297 = vmatpush3.bf16.msra.mxu1 %v3294_v57 }
 0x41e   : > { %3299 = vmatprep.subr.bf16.mxu1 %v3298_v60 }
 0x421   : > { %3301 = vmatpush3.bf16.msra.mxu1 %v3298_v60 }
 0x422   : > { %3303 = vmatprep.subr.bf16.mxu1 %v3302_v63 }
 0x425   : > { %3305 = vmatpush3.bf16.msra.mxu1 %v3302_v63 }
 0x4bf   : > { %v2878_v3 = vpop.f32.mrb[0].mxu1 }
 0x4c0   : > { %v1361_v4 = vadd.f32 %v2878_v3, %v2625_v2  ;;  %v1355_v5 = vpop.f32.mrb[1].mxu1  ;;  %v2626_v3 = vld [vmem:[#allocation16] ss:$0 sm:$0xff] }
 0x4c1   : > { %v1356_v6 = vadd.f32 %v2625_v2, %v1355_v5 }
 0x4c2   : > { %v1365_v10 = vmax.f32 %v1361_v4, 0.0 }
 0x4c3   : > { %v1364_v9 = vmax.f32 %v1356_v6, 0.0 }
 0x4c5   : > { %2911 = vmatprep.mubr.f32.mxu0 %v1364_v9 }
 0x4c6   : > { %2912 = vmatmul.mubr.f32.vlgmr.msra.gmra.mrb[2].mxu0 %v1365_v10  ;;  %v2628_v10 = vld [vmem:[#allocation22] ss:$0 sm:$0xff] }
 0x4c7   : > { %3249 = vmatpush3.bf16.msra.mxu0 %v3246_v1  ;;  %v1707_v1 = vld [vmem:[#allocation24 + $0x78] sm:$0xff] }
 0x4c8   : > { %3251 = vmatprep.subr.bf16.mxu0 %v3250_v11  ;;  %v3306_v2 = vpack.c.bf16 %v1707_v1, %v1706_v0 }
 0x4ca   : > { %3307 = vmatprep.subr.bf16.mxu1 %v3306_v2 }
 0x4cb   : > { %3253 = vmatpush3.bf16.msra.mxu0 %v3250_v11  ;;  %3309 = vmatpush3.bf16.msra.mxu1 %v3306_v2 }
 0x4cc   : > { %3255 = vmatprep.subr.bf16.mxu0 %v3254_v14 }
 0x4cf   : > { %3257 = vmatpush3.bf16.msra.mxu0 %v3254_v14 }
 0x4d0   : > { %3259 = vmatprep.subr.bf16.mxu0 %v3258_v17 }
 0x4d3   : > { %3261 = vmatpush3.bf16.msra.mxu0 %v3258_v17 }
 0x4d4   : > { %3263 = vmatprep.subr.bf16.mxu0 %v3262_v20 }
 0x4d7   : > { %3265 = vmatpush3.bf16.msra.mxu0 %v3262_v20 }
 0x4d8   : > { %3267 = vmatprep.subr.bf16.mxu0 %v3266_v23 }
 0x4db   : > { %3269 = vmatpush3.bf16.msra.mxu0 %v3266_v23  ;;  %v2629_v23 = vld [vmem:[#allocation25] ss:$0 sm:$0xff] }
 0x4dc   : > { %3271 = vmatprep.subr.bf16.mxu0 %v3270_v26 }
 0x4df   : > { %v2948_v31 = vpop.f32.mrb[2].mxu1  ;;  %3273 = vmatpush3.bf16.msra.mxu0 %v3270_v26 }
 0x4e0   : > { %v1563_v32 = vadd.f32 %v2948_v31, %v2627_v30  ;;  %v1557_v33 = vpop.f32.mrb[3].mxu1  ;;  %3275 = vmatprep.subr.bf16.mxu0 %v3274_v29 }
 0x4e1   : > { %v1558_v34 = vadd.f32 %v2627_v30, %v1557_v33 }
 0x4e2   : > { %v1577_v37 = vmax.f32 %v1563_v32, 0.0 }
 0x4e3   : > { %v1576_v35 = vmax.f32 %v1558_v34, 0.0  ;;  %v2951_v36 = vpop.f32.mrb[4].mxu1  ;;  %3277 = vmatpush3.bf16.msra.mxu0 %v3274_v29 }
 0x4e4   : > { %v1573_v38 = vadd.f32 %v2951_v36, %v2627_v30  ;;  %v1567_v39 = vpop.f32.mrb[5].mxu1 }
 0x4e5   : > { %v1568_v40 = vadd.f32 %v2627_v30, %v1567_v39  ;;  %2984 = vmatprep.mubr.f32.mxu0 %v1576_v35 }
 0x4e6   : > { %2985 = vmatmul.mubr.f32.vlgmr.msra.gmra.mrb[4].mxu0 %v1577_v37  ;;  %v1579_v42 = vmax.f32 %v1573_v38, 0.0 }
 0x4e7   : > { %v1578_v41 = vmax.f32 %v1568_v40, 0.0 }
 0x4e9   : > { %2987 = vmatprep.mubr.f32.mxu0 %v1578_v41 }
 0x4ea   : > { %2988 = vmatmul.mubr.f32.gmra.mrb[6].mxu0 %v1579_v42 }
 0x599   : > { %v2913_v4 = vpop.f32.mrb[2].mxu0 }
 0x59a   : > { %v1461_v5 = vadd.f32 %v2913_v4, %v2626_v3  ;;  %v1455_v6 = vpop.f32.mrb[3].mxu0 }
 0x59b   : > { %v1456_v7 = vadd.f32 %v2626_v3, %v1455_v6 }
 0x59c   : > { %v1465_v8 = vmax.f32 %v1461_v5, 0.0 }
 0x59d   : > { %v1464_v9 = vmax.f32 %v1456_v7, 0.0 }
 0x59e   : > { %1467 = vst [vmem:[#allocation2 + $0x8] sm:$0xff] %v1465_v8 }
 0x59f   : > { %1466 = vst [vmem:[#allocation2] sm:$0xff] %v1464_v9 }
 0x5b9   : > { %v2986_v11 = vpop.f32.mrb[4].mxu0 }
 0x5ba   : > { %v1675_v12 = vadd.f32 %v2986_v11, %v2628_v10  ;;  %v1669_v13 = vpop.f32.mrb[5].mxu0 }
 0x5bb   : > { %v1670_v14 = vadd.f32 %v2628_v10, %v1669_v13 }
 0x5bc   : > { %v1689_v17 = vmax.f32 %v1675_v12, 0.0 }
 0x5bd   : > { %v1688_v15 = vmax.f32 %v1670_v14, 0.0  ;;  %v2989_v16 = vpop.f32.mrb[6].mxu0 }
 0x5be   : > { %v1685_v18 = vadd.f32 %v2989_v16, %v2628_v10  ;;  %v1679_v19 = vpop.f32.mrb[7].mxu0 }
 0x5bf   : > { %v1680_v20 = vadd.f32 %v2628_v10, %v1679_v19  ;;  %3022 = vmatprep.mubr.f32.mxu1 %v1688_v15 }
 0x5c0   : > { %3023 = vmatmul.mubr.f32.vlgmr.msra.gmra.mrb[6].mxu1 %v1689_v17  ;;  %v1691_v22 = vmax.f32 %v1685_v18, 0.0 }
 0x5c1   : > { %v1690_v21 = vmax.f32 %v1680_v20, 0.0 }
 0x5c3   : > { %3025 = vmatprep.mubr.f32.mxu1 %v1690_v21 }
 0x5c4   : > { %3026 = vmatmul.mubr.f32.gmra.mrb[8].mxu1 %v1691_v22 }
 0x693   : > { %v3024_v24 = vpop.f32.mrb[6].mxu1 }
 0x694   : > { %v1787_v25 = vadd.f32 %v3024_v24, %v2629_v23  ;;  %v1781_v26 = vpop.f32.mrb[7].mxu1 }
 0x695   : > { %v1782_v27 = vadd.f32 %v2629_v23, %v1781_v26 }
 0x696   : > { %v1801_v28 = vmax.f32 %v1787_v25, 0.0 }
 0x697   : > { %v1800_v29 = vmax.f32 %v1782_v27, 0.0  ;;  %v3027_v30 = vpop.f32.mrb[8].mxu1 }
 0x698   : > { %1805 = vst [vmem:[#allocation3 + $0x8] sm:$0xff] %v1801_v28  ;;  %v1797_v31 = vadd.f32 %v3027_v30, %v2629_v23  ;;  %v1791_v32 = vpop.f32.mrb[9].mxu1 }
 0x699   : > { %1804 = vst [vmem:[#allocation3] sm:$0xff] %v1800_v29  ;;  %v1792_v33 = vadd.f32 %v2629_v23, %v1791_v32 }
 0x69a   : > { %v1803_v34 = vmax.f32 %v1797_v31, 0.0 }
 0x69b   : > { %v1802_v35 = vmax.f32 %v1792_v33, 0.0 }
 0x69c   : > { %1807 = vst [vmem:[#allocation3 + $0x18] sm:$0xff] %v1803_v34 }
 0x69d   : > { %1806 = vst [vmem:[#allocation3 + $0x10] sm:$0xff] %v1802_v35 }
 0x69e PF: > { %v5303_v36 = vld [vmem:[#allocation2] sm:$0xff]  ;;  %v5305_v37 = vld [vmem:[#allocation2 + $0x8] sm:$0xff]  ;;  %vm1829_vm0 = vcmask 130048   ;;  %v3646_v40 = vld [vmem:[#allocation27 + $0x8] sm:$0xff]   ;;  %v4473_v41 = vmov 0.0   ;;  %vm4474_vm1 = vmmov 0  }
 0x69f   : > { %v1814_v38 = vpack.c.bf16 %v5305_v37, %v5303_v36  ;;  %v3645_v39 = vld [vmem:[#allocation27] sm:$0xff]   ;;  %3034 = vmatprep.subr.bf16.mxu1 %v4473_v41  ;;  %3038 = vmatprep.mubr.msk.bf16.mxu1 %vm4474_vm1, %v4473_v41  ;;  %v1947_v44 = vld [vmem:[%s5281_s0 + $0x10] sm:$0xff]  ;;  %v1948_v46 = vld [vmem:[%s5281_s0 + $0x18] sm:$0xff]  ;;  %vm1898_vm2 = vcmask 261120   ;;  %p2640_p0 = scmp.ne.s32.totalorder %s4627_s6, 1 }
 0x6a0   : > { %3030 = vmatprep.mubr.msk.bf16.mxu0 %vm1829_vm0, %v3645_v39  ;;  %v1945_v42 = vld [vmem:[%s5281_s0] sm:$0xff]  ;;  %v1946_v43 = vld [vmem:[%s5281_s0 + $0x8] sm:$0xff]  ;;  %v3314_v47 = vpack.c.bf16 %v1948_v46, %v1947_v44  ;;  %v1951_v51 = vld [vmem:[%s5281_s0 + $0x30] sm:$0xff] }
 0x6a1   : > { %3028 = vmatprep.subr.bf16.mxu0 %v1814_v38  ;;  %v3310_v45 = vpack.c.bf16 %v1946_v43, %v1945_v42  ;;  %v1949_v48 = vld [vmem:[%s5281_s0 + $0x20] sm:$0xff]  ;;  %v1950_v49 = vld [vmem:[%s5281_s0 + $0x28] sm:$0xff]  ;;  %v1952_v52 = vld [vmem:[%s5281_s0 + $0x38] sm:$0xff] }
 0x6a2   : > { %3029 = vmatpush3.bf16.msra.mxu0 %v1814_v38  ;;  %v3318_v50 = vpack.c.bf16 %v1950_v49, %v1949_v48  ;;  %v3322_v53 = vpack.c.bf16 %v1952_v52, %v1951_v51  ;;  %v1953_v54 = vld [vmem:[%s5281_s0 + $0x40] sm:$0xff]  ;;  %v1954_v55 = vld [vmem:[%s5281_s0 + $0x48] sm:$0xff]  ;;  %v1955_v57 = vld [vmem:[%s5281_s0 + $0x50] sm:$0xff] }
 0x6a3   : > { %3311 = vmatprep.subr.bf16.mxu0 %v3310_v45  ;;  %v3326_v56 = vpack.c.bf16 %v1954_v55, %v1953_v54  ;;  %v1956_v58 = vld [vmem:[%s5281_s0 + $0x58] sm:$0xff]  ;;  %v1957_v60 = vld [vmem:[%s5281_s0 + $0x60] sm:$0xff]  ;;  %v1958_v61 = vld [vmem:[%s5281_s0 + $0x68] sm:$0xff] }
 0x6a4   : > { %v3330_v59 = vpack.c.bf16 %v1956_v58, %v1955_v57  ;;  %v3334_v62 = vpack.c.bf16 %v1958_v61, %v1957_v60  ;;  %v1817_v63 = vld [vmem:[#allocation3 + $0x10] sm:$0xff]  ;;  %v1815_v0 = vld [vmem:[#allocation3] sm:$0xff]  ;;  %v1818_v2 = vld [vmem:[#allocation3 + $0x18] sm:$0xff] }
 0x6a5   : > { %3031 = vmatmul.mubr.msk.bf16.vlgmr.msra.gmra.mrb[0].mxu0 %vm1829_vm0, %v3646_v40  ;;  %v1816_v5 = vld [vmem:[#allocation3 + $0x8] sm:$0xff]  ;;  %v2045_v21 = vld [vmem:[%s5288_s4] sm:$0xff]  ;;  %v2046_v22 = vld [vmem:[%s5288_s4 + $0x8] sm:$0xff] }
 0x6a6   : > { %3313 = vmatpush3.bf16.msra.mxu0 %v3310_v45  ;;  %v3647_v17 = vld [vmem:[#allocation28] sm:$0xff]   ;;  %v3342_v24 = vpack.c.bf16 %v2046_v22, %v2045_v21  ;;  %v2049_v27 = vld [vmem:[%s5288_s4 + $0x20] sm:$0xff]  ;;  %v2050_v28 = vld [vmem:[%s5288_s4 + $0x28] sm:$0xff] }
 0x6a7   : > { %3315 = vmatprep.subr.bf16.mxu0 %v3314_v47  ;;  %v1959_v18 = vld [vmem:[%s5281_s0 + $0x70] sm:$0xff]  ;;  %v1960_v19 = vld [vmem:[%s5281_s0 + $0x78] sm:$0xff]  ;;  %v3350_v29 = vpack.c.bf16 %v2050_v28, %v2049_v27  ;;  %v2053_v33 = vld [vmem:[%s5288_s4 + $0x40] sm:$0xff] }
 0x6a8   : > { %v3338_v20 = vpack.c.bf16 %v1960_v19, %v1959_v18  ;;  %v2047_v23 = vld [vmem:[%s5288_s4 + $0x10] sm:$0xff]  ;;  %v2048_v25 = vld [vmem:[%s5288_s4 + $0x18] sm:$0xff]  ;;  %v2054_v34 = vld [vmem:[%s5288_s4 + $0x48] sm:$0xff] }
 0x6a9   : > { %v3346_v26 = vpack.c.bf16 %v2048_v25, %v2047_v23  ;;  %v2051_v30 = vld [vmem:[%s5288_s4 + $0x30] sm:$0xff]  ;;  %v2052_v31 = vld [vmem:[%s5288_s4 + $0x38] sm:$0xff]  ;;  %v3358_v35 = vpack.c.bf16 %v2054_v34, %v2053_v33  ;;  %v2058_v42 = vld [vmem:[%s5288_s4 + $0x68] sm:$0xff] }
 0x6aa   : > { %3317 = vmatpush3.bf16.msra.mxu0 %v3314_v47  ;;  %v3354_v32 = vpack.c.bf16 %v2052_v31, %v2051_v30  ;;  %v2055_v38 = vld [vmem:[%s5288_s4 + $0x50] sm:$0xff]  ;;  %v2056_v39 = vld [vmem:[%s5288_s4 + $0x58] sm:$0xff] }
 0x6ab   : > { %3319 = vmatprep.subr.bf16.mxu0 %v3318_v50  ;;  %v3362_v40 = vpack.c.bf16 %v2056_v39, %v2055_v38  ;;  %v2060_v51 = vld [vmem:[%s5288_s4 + $0x78] sm:$0xff] }
 0x6ac   : > { %v2638_v60 = vld [vmem:[%s1054_s8] ss:$0 sm:$0xff] }
 0x6ae   : > { %3321 = vmatpush3.bf16.msra.mxu0 %v3318_v50  ;;  %v2059_v50 = vld [vmem:[%s5288_s4 + $0x70] sm:$0xff] }
 0x6af   : > { %3323 = vmatprep.subr.bf16.mxu0 %v3322_v53  ;;  %v3370_v52 = vpack.c.bf16 %v2060_v51, %v2059_v50 }
 0x6b2   : > { %3325 = vmatpush3.bf16.msra.mxu0 %v3322_v53  ;;  %v2636_v53 = vld [vmem:[%s1029_s17] ss:$0 sm:$0xff] }
 0x6b3   : > { %3327 = vmatprep.subr.bf16.mxu0 %v3326_v56 }
 0x6b6   : > { %3329 = vmatpush3.bf16.msra.mxu0 %v3326_v56 }
 0x6b7   : > { %3331 = vmatprep.subr.bf16.mxu0 %v3330_v59 }
 0x6ba   : > { %3333 = vmatpush3.bf16.msra.mxu0 %v3330_v59 }
 0x6bb   : > { %3335 = vmatprep.subr.bf16.mxu0 %v3334_v62 }
 0x6be   : > { %3337 = vmatpush3.bf16.msra.mxu0 %v3334_v62 }
 0x6bf   : > { %3339 = vmatprep.subr.bf16.mxu0 %v3338_v20 }
 0x6c2   : > { %3341 = vmatpush3.bf16.msra.mxu0 %v3338_v20 }
 0x778   : > { %v3032_v1 = vpop.f32.mrb[0].mxu0 }
 0x779   : > { %v1879_v3 = vadd.f32 %v3032_v1, %v1817_v63  ;;  %v1870_v4 = vpop.f32.mrb[1].mxu0  ;;  %v2639_v63 = vld [vmem:[%s1062_s25] ss:$0 sm:$0xff] }
 0x77a   : > { %v1871_v6 = vadd.f32 %v1870_v4, %v1815_v0  ;;  %v3033_v7 = vpop.f32.mrb[2].mxu0 }
 0x77b   : > { %v1882_v8 = vadd.f32 %v3033_v7, %v1818_v2  ;;  %v1873_v9 = vpop.f32.mrb[3].mxu0  ;;  %v1887_v11 = vmax.f32 %v1879_v3, 0.0 }
 0x77c   : > { %v1874_v10 = vadd.f32 %v1873_v9, %v1816_v5  ;;  %v1885_v13 = vmax.f32 %v1871_v6, 0.0 }
 0x77d   : > { %v1888_v12 = vmax.f32 %v1882_v8, 0.0 }
 0x77e   : > { %v1886_v14 = vmax.f32 %v1874_v10, 0.0 }
 0x77f   : > { %v1892_v15 = vpack.c.bf16 %v1888_v12, %v1887_v11 }
 0x780   : > { %v1891_v16 = vpack.c.bf16 %v1886_v14, %v1885_v13 }
 0x782   : > { %3035 = vmatpush3.bf16.msra.mxu1 %v1891_v16 }
 0x783   : > { %3036 = vmatprep.subr.bf16.mxu1 %v4473_v41  ;;  %v2057_v41 = vld [vmem:[%s5288_s4 + $0x60] sm:$0xff] }
 0x784   : > { %v3366_v43 = vpack.c.bf16 %v2058_v42, %v2057_v41 }
 0x786   : > { %3037 = vmatpush3.bf16.msra.mxu1 %v1892_v15 }
 0x787   : > { %3343 = vmatprep.subr.bf16.mxu1 %v3342_v24 }
 0x789   : > { %3039 = vmatmul.mubr.msk.bf16.vlgmr.msra.gmra.mrb[0].mxu1 %vm1898_vm2, %v3647_v17 }
 0x78a   : > { %3345 = vmatpush3.bf16.msra.mxu1 %v3342_v24 }
 0x78b   : > { %3347 = vmatprep.subr.bf16.mxu1 %v3346_v26 }
 0x78e   : > { %3349 = vmatpush3.bf16.msra.mxu1 %v3346_v26 }
 0x78f   : > { %3351 = vmatprep.subr.bf16.mxu1 %v3350_v29 }
 0x792   : > { %3353 = vmatpush3.bf16.msra.mxu1 %v3350_v29 }
 0x793   : > { %3355 = vmatprep.subr.bf16.mxu1 %v3354_v32 }
 0x796   : > { %3357 = vmatpush3.bf16.msra.mxu1 %v3354_v32 }
 0x797   : > { %3359 = vmatprep.subr.bf16.mxu1 %v3358_v35 }
 0x79a   : > { %3361 = vmatpush3.bf16.msra.mxu1 %v3358_v35 }
 0x79b   : > { %3363 = vmatprep.subr.bf16.mxu1 %v3362_v40 }
 0x79e   : > { %3365 = vmatpush3.bf16.msra.mxu1 %v3362_v40 }
 0x79f   : > { %3367 = vmatprep.subr.bf16.mxu1 %v3366_v43 }
 0x7a2   : > { %3369 = vmatpush3.bf16.msra.mxu1 %v3366_v43 }
 0x7a3   : > { %3371 = vmatprep.subr.bf16.mxu1 %v3370_v52 }
 0x7a6   : > { %3373 = vmatpush3.bf16.msra.mxu1 %v3370_v52 }
 0x85c   : > { %v1936_v44 = vpop.f32.mrb[0].mxu1 }
 0x85d   : > { %v1943_v45 = vadd.f32 %v1936_v44, %v5303_v36  ;;  %v3040_v46 = vpop.f32.mrb[1].mxu1 }
 0x85e   : > { %v1939_v47 = vpop.f32.mrb[2].mxu1 }
 0x85f   : > { %v1944_v48 = vadd.f32 %v1939_v47, %v5305_v37  ;;  %v3041_v49 = vpop.f32.mrb[3].mxu1  ;;  %3074 = vmatprep.mubr.f32.mxu0 %v1943_v45  ;;  %v2637_v37 = vld [vmem:[%s1046_s14] ss:$0 sm:$0xff] }
 0x861   : > { %3075 = vmatmul.mubr.f32.vlgmr.msra.gmra.mrb[4].mxu0 %v1944_v48 }
 0x934   : > { %v3076_v54 = vpop.f32.mrb[4].mxu0 }
 0x935   : > { %v2040_v55 = vadd.f32 %v3076_v54, %v2636_v53  ;;  %v2034_v36 = vpop.f32.mrb[5].mxu0 }
 0x936   : > { %v2035_v56 = vadd.f32 %v2636_v53, %v2034_v36 }
 0x937   : > { %v2044_v58 = vmax.f32 %v2040_v55, 0.0 }
 0x938   : > { %v2043_v57 = vmax.f32 %v2035_v56, 0.0 }
 0x93a   : > { %3109 = vmatprep.mubr.f32.mxu1 %v2043_v57 }
 0x93b   : > { %3110 = vmatmul.mubr.f32.vlgmr.msra.gmra.mrb[4].mxu1 %v2044_v58 }
 0xa0e   : > { %v3111_v59 = vpop.f32.mrb[4].mxu1 }
 0xa0f   : > { %v2140_v61 = vadd.f32 %v3111_v59, %v2637_v37  ;;  %v2134_v62 = vpop.f32.mrb[5].mxu1 }
 0xa10   : > { %v2135_v0 = vadd.f32 %v2637_v37, %v2134_v62 }
 0xa11   : > { %v2151_v1 = vmul.f32 %v2638_v60, %v2140_v61 }
 0xa12   : > { %v2150_v2 = vmul.f32 %v2638_v60, %v2135_v0  ;;  %2168 = sbr.rel (%p2640_p0) target bundleno = 2586 (0xa1a), region = 212 }
 0xa13   : > { %v2160_v3 = vadd.f32 %v2639_v63, %v2151_v1 }
 0xa14   : > { %v2159_v4 = vadd.f32 %v2639_v63, %v2150_v2 }
 0xa15   : > { %v2163_v5 = vmax.f32 %v2160_v3, 0.0 }
 0xa16   : > { %v2162_v6 = vmax.f32 %v2159_v4, 0.0 }
 0xa17   : > { %2165 = vst [vmem:[#allocation2 + $0x8] sm:$0xff] %v2163_v5 }
 0xa18   : > { %2164 = vst [vmem:[#allocation2] sm:$0xff] %v2162_v6  ;;  %2170 = vst [vmem:[#allocation2 + $0x8] sm:$0xff] (!%p2640_p0), %v2160_v3 }
 0xa19   : > { %2169 = vst [vmem:[#allocation2] sm:$0xff] %v2159_v4 }
 0xa1a PF: > { %v4475_v11 = vmov (!%p2640_p0), 0.0   ;;  %vm4476_vm3 = vmmov (!%p2640_p0), 0   ;;  %v2180_v13 = vld [vmem:[#allocation30] sm:$0x1] (!%p2640_p0)  ;;  %vm2226_vm4 = vcmask (!%p2640_p0), 1041408  }
 0xa1b   : > { %2177 = sbr.rel (%p2640_p0) target bundleno = 2972 (0xb9c), region = 216  ;;  %3112 = vmatprep.subr.bf16.mxu0 (!%p2640_p0), %v4475_v11  ;;  %3114 = vmatprep.mubr.msk.bf16.mxu0 (!%p2640_p0), %vm4476_vm3, %v4475_v11 }
 0xa20   : > { %v2171_v7 = vld [vmem:[#allocation2] sm:$0xff]  ;;  %v2172_v8 = vld [vmem:[#allocation2 + $0x8] sm:$0xff] }
 0xa21   : > { %2173 = vst [vmem:[#allocation40] sm:$0xff] %v2171_v7  ;;  %2174 = vst [vmem:[#allocation40 + $0x8] sm:$0xff] %v2172_v8  ;;  %v2178_v9 = vld [vmem:[#allocation2] sm:$0xff] (!%p2640_p0)  ;;  %v2179_v10 = vld [vmem:[#allocation2 + $0x8] sm:$0xff] (!%p2640_p0) }
 0xa22   : > { %v2181_v12 = vpack.c.bf16 %v2179_v10, %v2178_v9 }
 0xa24   : > { %3113 = vmatpush3.bf16.msra.mxu0 %v2181_v12 }
 0xa27   : > { %3115 = vmatmul.mubr.msk.bf16.vlgmr.msra.gmra.mrb[0].mxu0 %vm1829_vm0, %v2180_v13 }
 0xafa   : > { %v2219_v14 = vpop.f32.mrb[0].mxu0 }
 0xafb   : > { %v3116_v15 = vpop.f32.mrb[1].mxu0  ;;  %v2225_v16 = vmul.f32 %v2219_v14, %v2219_v14 }
 0xafc   : > { %v2222_v17 = vpop.f32.mrb[2].mxu0 }
 0xafd   : > { %v3117_v18 = vpop.f32.mrb[3].mxu0  ;;  %v2227_v19 = vsel %vm2226_vm4, %v2225_v16, 0.0 }
 0xafe   : > { %2228 = vadd.xlane.f32.xlu0 %v2227_v19 }
 0xb8b   : > { %v2229_v20 = vpop.xlane.xlu0 %2228 }
 0xb8c   : > { %v2230_v21 = vmax.f32 %v2229_v20, 1e-24 }
 0xb8e   : > { %3648 = vrsqrt.f32 %v2230_v21 }
 0xb98   : > { %v3649_v22 = vpop.eup %3648 }
 0xb99   : > { %v2232_v23 = vmul.f32 %v3649_v22, %v2219_v14 }
 0xb9b   : > { %2233 = vst [vmem:[#allocation41] sm:$0x3] %v2232_v23 }
 0xb9c PF: > { %p3580_p6 = scmp.eq.s32.totalorder %s4627_s6, 1  ;;  %s4477_s1 = smov [#allocation40]  }
 0xb9d   : > { %s2240_s16 = sshll.u32 %s4477_s1, 4  ;;  %s2241_s16 = int_to_ptr.vmem [resolvable:$true] %s2240_s16 }
 0xb9e   : > { %s4306_s12 = scalar_lea.vmem %s2241_s16, 256  ;;  %p4313_p2 = scmp.lt.s32.totalorder %s2241_s16, %s2241_s16 }
 0xb9f   : > { %p4307_p4 = scmp.ne.s32.totalorder %s2241_s16, %s4306_s12  ;;  %p4314_p7 = scmp.lt.s32.totalorder %s4306_s12, %s4306_s12 }
 0xba1   : > { %p4308_p5 = pnand %p4307_p4, %p3580_p6  ;;  %p4315_p9 = por %p4314_p7, %p4313_p2 }
 0xba3   : > { %p4309_p8 = pneg %p4308_p5 }
 0xba5   : > { %p4316_p3 = pnand %p4315_p9, %p4309_p8 }
 0xba7   : > { %4319 = shalt.err (!%p4316_p3)
}
 0xba8   : > { %s5578_s27 = sld [smem:[#allocation82_spill]] }
 0xbae   : > { %s5579_s9 = smov %s5578_s27  ;;  %s4320_s5 = scalar_lea.hbm %s5578_s27, 256 }
 0xbaf   : > { %p4321_p10 = scmp.ne.s32.totalorder %s5579_s9, %s4320_s5  ;;  %p4326_p11 = scmp.lt.u32.totalorder %s4320_s5, %s5579_s9 }
 0xbb1   : > { %p4322_p12 = pnand %p4321_p10, %p3580_p6 }
 0xbb3   : > { %p4323_p13 = pneg %p4322_p12 }
 0xbb5   : > { %p4328_p1 = pnand %p4326_p11, %p4323_p13 }
 0xbb7   : > { %4331 = shalt.err (!%p4328_p1)
}
 0xbb8   : > { %s4478_s17 = smov 128   ;;  %s4479_s10 = smov 8  }
 0xbb9   : > { %3467 = dma.vmem_to_hbm [thread:$0]  (%p3580_p6), %s2241_s16, 256, %s5579_s9, [#allocation6], %s4478_s17, %s4478_s17, %s4479_s10  }
 0xbba   : > { %s4480_s23 = smov [#allocation41]  }
 0xbbb   : > { %s2254_s8 = sshll.u32 %s4480_s23, 4  ;;  %s2255_s8 = int_to_ptr.vmem [resolvable:$true] %s2254_s8 }
 0xbbc   : > { %s4332_s25 = scalar_lea.vmem %s2255_s8, 32  ;;  %p4339_p8 = scmp.lt.s32.totalorder %s2255_s8, %s2255_s8 }
 0xbbd   : > { %p4333_p0 = scmp.ne.s32.totalorder %s2255_s8, %s4332_s25  ;;  %p4340_p2 = scmp.lt.s32.totalorder %s4332_s25, %s4332_s25 }
 0xbbf   : > { %p4334_p4 = pnand %p4333_p0, %p3580_p6  ;;  %p4341_p7 = por %p4340_p2, %p4339_p8 }
 0xbc1   : > { %p4335_p5 = pneg %p4334_p4 }
 0xbc3   : > { %p4342_p9 = pnand %p4341_p7, %p4335_p5 }
 0xbc5   : > { %4345 = shalt.err (!%p4342_p9)
}
 0xbc6   : > { %s5580_s19 = sld [smem:[#allocation83_spill]] }
 0xbcc   : > { %s4346_s28 = scalar_lea.hbm %s5580_s19, 32 }
 0xbcd   : > { %p4347_p3 = scmp.ne.s32.totalorder %s5580_s19, %s4346_s28  ;;  %p4352_p13 = scmp.lt.u32.totalorder %s4346_s28, %s5580_s19 }
 0xbcf   : > { %p4348_p10 = pnand %p4347_p3, %p3580_p6 }
 0xbd1   : > { %p4349_p12 = pneg %p4348_p10 }
 0xbd3   : > { %p4354_p11 = pnand %p4352_p13, %p4349_p12 }
 0xbd5   : > { %4357 = shalt.err (!%p4354_p11)
}
 0xbd6   : > { %3469 = dma.vmem_to_hbm [thread:$0]  (%p3580_p6), %s2255_s8, 32, %s5580_s19, [#allocation42]  }
 0xbd7   : > { %4423 = dma.done.wait (%p3580_p6), [#allocation6], 256  }
 0xbd8   : > { %4425 = vsyncadd (%p3580_p6), [#allocation6], 4294967040 }
 0xbd9   : > { %4427 = dma.done.wait (%p3580_p6), [#allocation42], 32  }
 0xbda   : > { %4429 = vsyncadd (%p3580_p6), [#allocation42], 4294967264 }
 0xbdb PF: > { %s5581_s0 = sld [smem:[#allocation57_spill]]  ;;  %s5582_s27 = sld [smem:[#allocation59_spill]] }
 0xbdc   : > { %p52_p1 = scmp.ge.s32.totalorder %s4825_s30, 4   ;;  %s5583_s5 = smov %s4436_s26 }
 0xbdd   : > { %s5585_s28 = smov %s4825_s30 }
 0xbde   :  { %54 = sbr.rel (!%p52_p1) target bundleno = 43 (0x2b), region = 297 }
 0xbe1   : > { %s5584_s26 = smov %s5581_s0 }
 0xbe5   :  { %2271 = vsyncpa [#allocation5], 1 }
 0xbe6   :  { %2273 = vsyncpa [#allocation5 + $0x1], 1 }
 0xbe7   :  { %2274 = vsyncpa [#allocation8], 1 }
 0xbe8   :  { %2275 = vsyncpa [#allocation11], 1 }
 0xbe9   :  { %2276 = vsyncpa [#allocation14], 1 }
 0xbea   :  { %2277 = vsyncpa [#allocation17], 1 }
 0xbeb   :  { %2278 = vsyncpa [#allocation20], 1 }
 0xbec   :  { %2279 = vsyncpa [#allocation23], 1 }
 0xbed   :  { %2280 = vsyncpa [#allocation26], 1 }
 0xbee   :  { %2281 = vsyncpa [#allocation29], 1 }
 0xbef   :  { %2282 = vsyncpa [#allocation32], 1 }
 0xbf0   :  { %2284 = vsyncpa [#allocation32 + $0x1], 1 }
 0xbf1   :  { %2285 = vsyncpa [#allocation35], 1 }
 0xbf2   :  { %2287 = vsyncpa [#allocation35 + $0x1], 1 }
 0xbf3   :  { %2288 = vsyncpa [#allocation38], 1 }
 0xbf4   :  { %2290 = vsyncpa [#allocation38 + $0x1], 1 }
 0xbf5   :  { %2291 = vsyncpa [#allocation6], 1 }
 0xbf6   :  { %2293 = vsyncpa [#allocation6 + $0x1], 1 }
 0xbf7   :  { %2294 = vsyncpa [#allocation42], 1 }

</bundles_post_ra>
